<compile_context>
chip_gen: v7x
topology: tpu7x:2x2x1
jax: 0.10.0
libtpu: 0.0.40
codegen_flags: <defaults>
</compile_context>

<pallas_src>
import jax
import jax.numpy as jnp
from jax.experimental import pallas as pl
from jax.experimental.pallas import tpu as pltpu

C_IN, C_OUT, KH, KW = 384, 768, 2, 2
K = KH * KW * C_IN  # 1536


def _matmul_bias_kernel(p_ref, w_ref, b_ref, o_ref):
    # p_ref: (Mp, K) bf16, w_ref: (K, TN) bf16, b_ref: (1, TN) f32, o_ref: (Mp, TN) f32
    acc = jnp.dot(p_ref[...], w_ref[...], preferred_element_type=jnp.float32)
    o_ref[...] = (acc + b_ref[...]).astype(o_ref.dtype)


def pack_conv_params(weight, bias):
    """One-time packing of PyTorch-layout conv params (done at init, not per call).

    weight: (C_out, C_in, 2, 2) f32 -> (K, C_out) bf16 with K-order (kh, kw, c)
    bias:   (C_out,) f32            -> (1, C_out) f32
    """
    w_mat = jnp.transpose(weight, (2, 3, 1, 0)).reshape(K, C_OUT).astype(jnp.bfloat16)
    b_mat = bias.reshape(1, C_OUT).astype(jnp.float32)
    return w_mat, b_mat


@jax.jit
def conv2d_2x2_stride2_pallas(x_nchw, w_mat, b_mat):
    """nn.Conv2d(384, 768, kernel_size=2, stride=2) forward. NCHW in / NCHW out."""
    N, C_in, H, W = x_nchw.shape
    Ho, Wo = H // 2, W // 2
    C_out = w_mat.shape[1]
    Kk = 4 * C_in
    M = N * Ho * Wo                       # 49 per image; scales with batch
    m_pad = ((M + 7) // 8) * 8            # 56 : sublane-aligned rows

    # --- glue #1 (ONE fused XLA op: transpose + pad + bf16 cast): NCHW -> patches ---
    # Kept outside the kernel on purpose (see header): it is a fundamental
    # relayout of channels-major data and XLA's transpose fusion is the
    # efficient place for it; the kernel stays a pure MXU matmul.
    x6 = x_nchw.reshape(N, C_in, Ho, 2, Wo, 2)                      # (n,c,ho,kh,wo,kw)
    patches = jnp.transpose(x6, (0, 2, 4, 3, 5, 1)).reshape(M, Kk)  # (n,ho,wo),(kh,kw,c)
    patches = jnp.pad(patches.astype(jnp.bfloat16), ((0, m_pad - M), (0, 0)))

    # --- hot path: single matmul + bias; C_out split across 2 grid steps ---
    # grid=(2,) "parallel": megacore split on v7x, DMA/compute overlap on v5e,
    # ~neutral on v6e.  No further tiling (per-step overhead ~0.35 us).
    tn = C_out // 2
    cost = pl.CostEstimate(
        flops=2 * m_pad * Kk * C_out,
        transcendentals=0,
        bytes_accessed=(m_pad * Kk * 2          # patches (bf16)
                        + Kk * C_out * 2        # weight  (bf16)
                        + C_out * 4             # bias    (f32)
                        + m_pad * C_out * 4),   # output  (f32)
    )
    out = pl.pallas_call(
        _matmul_bias_kernel,
        out_shape=jax.ShapeDtypeStruct((m_pad, C_out), jnp.float32),
        grid=(2,),
        in_specs=[
            pl.BlockSpec((m_pad, Kk), lambda j: (0, 0)),
            pl.BlockSpec((Kk, tn), lambda j: (0, j)),
            pl.BlockSpec((1, tn), lambda j: (0, j)),
        ],
        out_specs=pl.BlockSpec((m_pad, tn), lambda j: (0, j)),
        compiler_params=pltpu.CompilerParams(dimension_semantics=("parallel",)),
        cost_estimate=cost,
    )(patches, w_mat, b_mat)

    # --- glue #2 (ONE fused XLA op: slice + reshape + transpose): -> NCHW f32 ---
    out = out[:M].reshape(N, Ho, Wo, C_out)
    return jnp.transpose(out, (0, 3, 1, 2))                         # (N, C_out, Ho, Wo)


if __name__ == "__main__":
    key = jax.random.PRNGKey(0)
    kx, kw, kb = jax.random.split(key, 3)

    # Shapes implied by the module's forward.
    N, H, W = 1, 14, 14
    x = jax.random.normal(kx, (N, C_IN, H, W), dtype=jnp.float32)

    fan_in = C_IN * KH * KW
    bound = 1.0 / (fan_in ** 0.5)
    weight = jax.random.uniform(kw, (C_OUT, C_IN, KH, KW), jnp.float32, -bound, bound)
    bias = jax.random.uniform(kb, (C_OUT,), jnp.float32, -bound, bound)

    # One-time parameter packing (hoisted out of the per-call hot path).
    w_mat, b_mat = jax.block_until_ready(pack_conv_params(weight, bias))

    y = conv2d_2x2_stride2_pallas(x, w_mat, b_mat)
    y = jax.block_until_ready(y)
    assert y.shape == (N, C_OUT, H // 2, W // 2), y.shape

    # Sanity check against XLA's f32 conv (tolerance loosened for bf16 weight/activation).
    y_ref = jax.lax.conv_general_dilated(
        x, weight, window_strides=(2, 2), padding="VALID",
        dimension_numbers=("NCHW", "OIHW", "NCHW"),
    ) + bias.reshape(1, C_OUT, 1, 1)
    if not jnp.allclose(y, y_ref, atol=3e-2, rtol=3e-2):
        max_err = jnp.max(jnp.abs(y - y_ref))
        raise AssertionError(f"Pallas conv does not match reference, max err {max_err}")

    print("KERNEL_OK")
</pallas_src>

<mosaic_0001>
module attributes {stable_mosaic.version = 11 : i64} {
  func.func @_matmul_bias_kernel(%arg0: i32, %arg1: memref<56x1536xbf16, #tpu.memory_space<vmem>>, %arg2: memref<1536x384xbf16, #tpu.memory_space<vmem>>, %arg3: memref<1x384xf32, #tpu.memory_space<vmem>>, %arg4: memref<56x384xf32, #tpu.memory_space<vmem>>) attributes {dimension_semantics = [#tpu.dimension_semantics<parallel>], iteration_bounds = array<i64: 2>, scalar_prefetch = 0 : i64, scratch_operands = 0 : i64, tpu.core_type = #tpu.core_type<tc>, window_params = [{pipeline_mode = #tpu.pipeline_mode<synchronous>, transform_indices = @transform_0, window_bounds = array<i64: 56, 1536>}, {transform_indices = @transform_1, window_bounds = array<i64: 1536, 384>}, {transform_indices = @transform_2, window_bounds = array<i64: 1, 384>}, {transform_indices = @transform_3, window_bounds = array<i64: 56, 384>}]} {
    %c0 = arith.constant 0 : index
    %c0_0 = arith.constant 0 : index
    %0 = vector.load %arg1[%c0, %c0_0] : memref<56x1536xbf16, #tpu.memory_space<vmem>>, vector<56x1536xbf16>
    %c0_1 = arith.constant 0 : index
    %c0_2 = arith.constant 0 : index
    %1 = vector.load %arg2[%c0_1, %c0_2] : memref<1536x384xbf16, #tpu.memory_space<vmem>>, vector<1536x384xbf16>
    %cst = arith.constant dense<0.000000e+00> : vector<56x384xf32>
    %2 = tpu.matmul %0, %1, %cst {dimension_numbers = #tpu.dot_dimension_numbers<[1], [0], [0], [1], [0, 0, 1, 1], [], []>} : vector<56x1536xbf16>, vector<1536x384xbf16>, vector<56x384xf32> -> vector<56x384xf32>
    %c0_3 = arith.constant 0 : index
    %c0_4 = arith.constant 0 : index
    %3 = vector.load %arg3[%c0_3, %c0_4] : memref<1x384xf32, #tpu.memory_space<vmem>>, vector<1x384xf32>
    %4 = vector.broadcast %3 : vector<1x384xf32> to vector<56x384xf32>
    %5 = arith.addf %2, %4 : vector<56x384xf32>
    %c0_5 = arith.constant 0 : index
    %c0_6 = arith.constant 0 : index
    %6 = vector.load %arg4[%c0_5, %c0_6] : memref<56x384xf32, #tpu.memory_space<vmem>>, vector<56x384xf32>
    tpu.vector_store %arg4[%c0_5, %c0_6], %5 {strides = array<i32>} : memref<56x384xf32, #tpu.memory_space<vmem>>, vector<56x384xf32>,
    return
  }
  func.func @transform_0(%arg0: i32) -> (i32, i32) {
    %c0_i32 = arith.constant 0 : i32
    %c0_i32_0 = arith.constant 0 : i32
    %c0_i32_1 = arith.constant 0 : i32
    return %c0_i32, %c0_i32_0 : i32, i32
  }
  func.func @transform_1(%arg0: i32) -> (i32, i32) {
    %c0_i32 = arith.constant 0 : i32
    %c0_i32_0 = arith.constant 0 : i32
    return %c0_i32, %arg0 : i32, i32
  }
  func.func @transform_2(%arg0: i32) -> (i32, i32) {
    %c0_i32 = arith.constant 0 : i32
    %c0_i32_0 = arith.constant 0 : i32
    return %c0_i32, %arg0 : i32, i32
  }
  func.func @transform_3(%arg0: i32) -> (i32, i32) {
    %c0_i32 = arith.constant 0 : i32
    %c0_i32_0 = arith.constant 0 : i32
    return %c0_i32, %arg0 : i32, i32
  }
}

</mosaic_0001>

<bundles_post_ra>
// kernel: conv2d_2x2_stride2_pallas.1
= control target key start
LH: loop header
LB: loop body
LE: loop exit
PB: predicated region body
PF: predicated region fallthrough
CT: control target
= control target key end

     0   :  { %8 = vsyncpa [#allocation3], 0  ;;  %s5589_s0 = inlined_call_operand.vmem [shape: bf16[56,1536], index: 0, kind: input, shape index: {}]   ;;  %s5590_s1 = inlined_call_operand.hbm [shape: bf16[1536,768], index: 1, kind: input, shape index: {}]   ;;  %s5591_s2 = inlined_call_operand.hbm [shape: f32[1,768], index: 2, kind: input, shape index: {}]   ;;  %s5592_s3 = inlined_call_operand.vmem [shape: f32[56,768], index: 3, kind: output, shape index: {}]  }
   0x1   :  { %10 = vsyncpa [#allocation3 + $0x1], 0 }
   0x2   :  { %11 = vsyncpa [#allocation5], 0 }
   0x3   :  { %13 = vsyncpa [#allocation5 + $0x1], 0  ;;  %s4718_s12 = smov 0   ;;  %s4720_s13 = smov 0  }
   0x4   :  { %s4722_s14 = smov 0   ;;  %s4724_s15 = smov 0  }
   0x5 LB: > { %s4737_s16 = sadd.s32 4294967295, %s4691_s15   ;;  %s4740_s17 = sadd.s32 1, %s4691_s15   ;;  %s4691_s15 = sphi %s4724_s15, %s5604_s15   ;;  %s4687_s14 = sphi %s4722_s14, %s5603_s14   ;;  %s4683_s13 = sphi %s4720_s13, %s5602_s13   ;;  %s4679_s12 = sphi %s4718_s12, %s5601_s12  }
   0x6   : > { %s44_s18 = ssub.s32 %s4691_s15, %s4740_s17  ;;  %s47_s19 = sadd.s32 1, %s4687_s14 }
   0x7   : > { %p45_p0 = scmp.eq.s32.totalorder %s44_s18, 0  ;;  %p54_p1 = scmp.ne.s32.totalorder %s4687_s14, %s4683_s13 }
   0x8   : > { %p55_p2 = scmp.eq.s32.totalorder %s4691_s15, 0  ;;  %p60_p3 = scmp.ne.s32.totalorder %s4683_s13, %s4679_s12 }
   0x9   : > { %s4750_s20 = scalar_select %p45_p0, %s4687_s14, %s47_s19  }
   0xa   : > { %p56_p4 = por %p55_p2, %p54_p1  ;;  %p61_p5 = scmp.eq.s32.totalorder %s4737_s16, 0 }
   0xb   : > { %p110_p6 = scmp.eq.s32.totalorder %s4737_s16, 1  ;;  %p4107_p8 = scmp.lt.s32.totalorder %s4691_s15, 2 }
   0xc   : > { %p4754_p7 = por %p61_p5, %p60_p3  ;;  %s4764_s23 = sand.u32 1, %s4687_s14  }
   0xd   : > { %p4759_p9 = por %p110_p6, %p54_p1  ;;  %s4091_s24 = smul.u32 2304, %s4764_s23 }
   0xe   : > { %s5594_s21 = scalar_select %p4754_p7, 1, 0 }
   0xf   : > { %s5595_s22 = scalar_select %p4759_p9, 1, 0 }
  0x10   : > { %s3756_s25 = smul.u32 192, %s4691_s15  ;;  %p4768_p10 = pnand %p4107_p8, %p56_p4 }
  0x11   : > { %s143_s30 = scalar_lea.vmem [#allocation2], %s4091_s24  ;;  %s140_s5 = scalar_lea.sflag [#allocation3], %s4764_s23 }
  0x12   : > { %s4775_s29 = scalar_lea.hbm %s5590_s1, %s3756_s25  ;;  %s150_s4 = sshll.u32 %s143_s30, 4  ;;  %s4777_s4 = int_to_ptr.vmem [resolvable:$true] %s150_s4 }
  0x13   : > { %s4593_s6 = scalar_lea.hbm %s4775_s29, 36864  ;;  %p4595_p12 = pneg %p4768_p10 }
  0x14   : > { %p4594_p11 = scmp.ne.s32.totalorder %s4775_s29, %s4593_s6  ;;  %s4598_s9 = scalar_lea.hbm %s5590_s1, 73728 }
  0x15   : > { %p4599_p1 = scmp.lt.u32.totalorder %s4775_s29, %s5590_s1  ;;  %p4600_p2 = scmp.lt.u32.totalorder %s4598_s9, %s4593_s6 }
  0x16   : > { %p4596_p13 = pnand %p4595_p12, %p4594_p11  ;;  %p4602_p4 = scmp.lt.u32.totalorder %s4593_s6, %s4775_s29 }
  0x17   : > { %p4601_p3 = por %p4600_p2, %p4599_p1 }
  0x18   : > { %p4597_p0 = pneg %p4596_p13 }
  0x19   : > { %p4603_p5 = por %p4602_p4, %p4601_p3 }
  0x1b   : > { %p4604_p6 = pnand %p4603_p5, %p4597_p0 }
  0x1d   : > { %4607 = shalt.err (!%p4604_p6)
}
  0x1e   : > { %s4608_s12 = scalar_lea.vmem %s4777_s4, 36864  ;;  %s4693_s18 = smov [#allocation2]  }
  0x1f   : > { %p4609_p8 = scmp.ne.s32.totalorder %s4777_s4, %s4608_s12  ;;  %s4613_s19 = sshll.u32 %s4693_s18, 4  ;;  %s4614_s19 = int_to_ptr.vmem [resolvable:$false] %s4613_s19 }
  0x20   : > { %s4615_s24 = scalar_lea.vmem %s4614_s19, 73728  ;;  %p4616_p9 = scmp.lt.s32.totalorder %s4777_s4, %s4614_s19 }
  0x21   : > { %p4611_p11 = pnand %p4609_p8, %p4595_p12  ;;  %p4617_p1 = scmp.lt.s32.totalorder %s4615_s24, %s4608_s12 }
  0x23   : > { %p4612_p13 = pneg %p4611_p11  ;;  %p4618_p2 = por %p4617_p1, %p4616_p9 }
  0x25   : > { %p4619_p3 = pnand %p4618_p2, %p4612_p13 }
  0x27   : > { %4622 = shalt.err (!%p4619_p3)
}
  0x28   : > { %s4694_s25 = smov 384   ;;  %s4695_s27 = smov 192  }
  0x29   : > { %s4696_s28 = smov 12   ;;  %p3416_p0 = scmp.ge.s32.totalorder %s4691_s15, 1 }
  0x2a   : > { %4103 = dma.hbm_to_vmem [thread:$0]  (!%p4768_p10), %s4775_s29, 36864, %s4777_s4, %s140_s5, %s4694_s25, %s4695_s27, %s4696_s28  }
  0x2b   : > { %p177_p9 = scmp.lt.s32.totalorder %s4691_s15, 3  ;;  %s4092_s30 = smul.u32 3, %s4764_s23 }
  0x2c   : > { %s3757_s7 = smul.u32 48, %s4691_s15  ;;  %s161_s29 = scalar_lea.sflag [#allocation5], %s4764_s23 }
  0x2d   : > { %p4810_p4 = pnand %p3416_p0, %p177_p9  ;;  %s164_s11 = scalar_lea.vmem [#allocation4], %s4092_s30 }
  0x2e   : > { %s4818_s10 = scalar_lea.hbm %s5591_s2, %s3757_s7  ;;  %s172_s12 = sshll.u32 %s164_s11, 4  ;;  %s173_s12 = int_to_ptr.vmem [resolvable:$true] %s172_s12 }
  0x2f   : > { %s5597_s6 = scalar_select %p4810_p4, 1, 0 }
  0x30   : > { %s4623_s4 = scalar_lea.hbm %s4818_s10, 48  ;;  %s4628_s18 = scalar_lea.hbm %s5591_s2, 96 }
  0x31   : > { %p4624_p5 = scmp.ne.s32.totalorder %s4818_s10, %s4623_s4  ;;  %p4629_p11 = scmp.lt.u32.totalorder %s4818_s10, %s5591_s2 }
  0x32   : > { %p4630_p13 = scmp.lt.u32.totalorder %s4628_s18, %s4623_s4  ;;  %p4632_p2 = scmp.lt.u32.totalorder %s4623_s4, %s4818_s10 }
  0x33   : > { %p4626_p6 = pnand %p4624_p5, %p4595_p12 }
  0x34   : > { %p4631_p1 = por %p4630_p13, %p4629_p11 }
  0x35   : > { %p4627_p8 = pneg %p4626_p6 }
  0x36   : > { %p4633_p3 = por %p4632_p2, %p4631_p1 }
  0x38   : > { %p4634_p0 = pnand %p4633_p3, %p4627_p8 }
  0x3a   : > { %4637 = shalt.err (!%p4634_p0)
}
  0x3b   : > { %s4638_s23 = scalar_lea.vmem %s173_s12, 48  ;;  %s4697_s25 = smov [#allocation4]  }
  0x3c   : > { %p4639_p9 = scmp.ne.s32.totalorder %s173_s12, %s4638_s23  ;;  %s4643_s27 = sshll.u32 %s4697_s25, 4  ;;  %s4644_s27 = int_to_ptr.vmem [resolvable:$false] %s4643_s27 }
  0x3d   : > { %s4645_s28 = scalar_lea.vmem %s4644_s27, 96  ;;  %p4646_p7 = scmp.lt.s32.totalorder %s173_s12, %s4644_s27 }
  0x3e   : > { %p4641_p5 = pnand %p4639_p9, %p4595_p12  ;;  %p4647_p4 = scmp.lt.s32.totalorder %s4645_s28, %s4638_s23 }
  0x40   : > { %p4642_p6 = pneg %p4641_p5  ;;  %p4648_p11 = por %p4647_p4, %p4646_p7 }
  0x42   : > { %p4649_p13 = pnand %p4648_p11, %p4642_p6 }
  0x44   : > { %4652 = shalt.err (!%p4649_p13)
}
  0x45   : > { %4106 = dma.hbm_to_vmem [thread:$0]  (!%p4768_p10), %s4818_s10, 48, %s173_s12, %s161_s29  }
  0x46   : > { %p5598_p8 = scmp.ne.s32.totalorder %s5597_s6, 0 }
  0x47   : > { %s4843_s30 = sand.u32 (!%p5598_p8), 1, %s4683_s13   ;;  %p5599_p7 = scmp.ne.s32.totalorder (!%p5598_p8), %s5594_s21, 0 }
  0x48   : > { %181 = sbr.rel (%p5598_p8) target bundleno = 654 (0x28e), region = 32  ;;  %s184_s8 = scalar_lea.sflag (!%p5598_p8), [#allocation3], %s4843_s30 }
  0x49   : > { %s4093_s7 = smul.u32 (!%p5598_p8), 2304, %s4843_s30 }
  0x4b   : > { %s4847_s9 = scalar_lea.vmem (!%p5598_p8), [#allocation2], %s4093_s7 }
  0x4f   : > { %4670 = dma.done.wait (%p5599_p7), %s184_s8, 36864  }
  0x50   : > { %4672 = vsyncadd (%p5599_p7), %s184_s8, 4294930432  ;;  %s4094_s26 = smul.u32 3, %s4843_s30  ;;  %s193_s6 = scalar_lea.sflag [#allocation5], %s4843_s30 }
  0x52   : > { %s4855_s10 = scalar_lea.vmem [#allocation4], %s4094_s26 }
  0x53   : > { %4674 = dma.done.wait (%p5599_p7), %s193_s6, 48  }
  0x54   : > { %4676 = vsyncadd (%p5599_p7), %s193_s6, 4294967248  ;;  %v4143_v0 = vld [vmem:[%s4847_s9 + $0x4] ss:$12 sps:$4 sm:$0xff]   ;;  %v4147_v2 = vld [vmem:[%s4847_s9] ss:$12 sps:$4 sm:$0xff]   ;;  %p5600_p10 = scmp.ne.s32.totalorder %s5595_s22, 0 }
  0x55   : > { %v4145_v1 = vld [vmem:[%s4847_s9 + $0x184] ss:$12 sps:$4 sm:$0xff]   ;;  %2428 = vmatprep.subr.bf16.mxu1 %v4143_v0  ;;  %v4148_v3 = vld [vmem:[%s4847_s9 + $0x180] ss:$12 sps:$4 sm:$0xff]   ;;  %v4149_v4 = vld [vmem:[%s4847_s9 + $0x1c] ss:$12 sps:$4 sm:$0xff]  }
  0x56   : > { %2499 = vmatprep.subr.bf16.mxu0 %v4145_v1  ;;  %2429 = vmatpush1.bf16.msra.mxu1 %v4147_v2  ;;  %v4151_v5 = vld [vmem:[%s4847_s9 + $0x19c] ss:$12 sps:$4 sm:$0xff]   ;;  %v4153_v6 = vld [vmem:[%s4847_s9 + $0x18] ss:$12 sps:$4 sm:$0xff]   ;;  %v4155_v8 = vld [vmem:[%s4847_s9 + $0x34] ss:$12 sps:$4 sm:$0xff]  }
  0x57   : > { %2500 = vmatpush1.bf16.msra.mxu0 %v4148_v3  ;;  %2430 = vmatprep.subr.bf16.mxu1 %v4149_v4  ;;  %v4154_v7 = vld [vmem:[%s4847_s9 + $0x198] ss:$12 sps:$4 sm:$0xff]   ;;  %v4157_v9 = vld [vmem:[%s4847_s9 + $0x1b4] ss:$12 sps:$4 sm:$0xff]   ;;  %v4159_v10 = vld [vmem:[%s4847_s9 + $0x30] ss:$12 sps:$4 sm:$0xff]  }
  0x58   : > { %2501 = vmatprep.subr.bf16.mxu0 %v4151_v5  ;;  %v4160_v11 = vld [vmem:[%s4847_s9 + $0x1b0] ss:$12 sps:$4 sm:$0xff]   ;;  %v4161_v12 = vld [vmem:[%s4847_s9 + $0x4c] ss:$12 sps:$4 sm:$0xff]   ;;  %v4165_v14 = vld [vmem:[%s4847_s9 + $0x48] ss:$12 sps:$4 sm:$0xff]  }
  0x59   : > { %v4163_v13 = vld [vmem:[%s4847_s9 + $0x1cc] ss:$12 sps:$4 sm:$0xff]   ;;  %v4166_v15 = vld [vmem:[%s4847_s9 + $0x1c8] ss:$12 sps:$4 sm:$0xff]   ;;  %v4167_v16 = vld [vmem:[%s4847_s9 + $0x64] ss:$12 sps:$4 sm:$0xff]  }
  0x5a   : > { %2431 = vmatpush1.bf16.msra.mxu1 %v4153_v6  ;;  %v4169_v17 = vld [vmem:[%s4847_s9 + $0x1e4] ss:$12 sps:$4 sm:$0xff]   ;;  %v4171_v18 = vld [vmem:[%s4847_s9 + $0x60] ss:$12 sps:$4 sm:$0xff]   ;;  %v4173_v20 = vld [vmem:[%s4847_s9 + $0x7c] ss:$12 sps:$4 sm:$0xff]  }
  0x5b   : > { %2502 = vmatpush1.bf16.msra.mxu0 %v4154_v7  ;;  %2432 = vmatprep.subr.bf16.mxu1 %v4155_v8  ;;  %v4172_v19 = vld [vmem:[%s4847_s9 + $0x1e0] ss:$12 sps:$4 sm:$0xff]   ;;  %v4175_v21 = vld [vmem:[%s4847_s9 + $0x1fc] ss:$12 sps:$4 sm:$0xff]   ;;  %v4177_v22 = vld [vmem:[%s4847_s9 + $0x78] ss:$12 sps:$4 sm:$0xff]  }
  0x5c   : > { %2503 = vmatprep.subr.bf16.mxu0 %v4157_v9  ;;  %v4178_v23 = vld [vmem:[%s4847_s9 + $0x1f8] ss:$12 sps:$4 sm:$0xff]   ;;  %v4179_v24 = vld [vmem:[%s4847_s9 + $0x94] ss:$12 sps:$4 sm:$0xff]   ;;  %v4183_v26 = vld [vmem:[%s4847_s9 + $0x90] ss:$12 sps:$4 sm:$0xff]  }
  0x5d   : > { %v4181_v25 = vld [vmem:[%s4847_s9 + $0x214] ss:$12 sps:$4 sm:$0xff]   ;;  %v4184_v27 = vld [vmem:[%s4847_s9 + $0x210] ss:$12 sps:$4 sm:$0xff]   ;;  %v4185_v28 = vld [vmem:[%s4847_s9 + $0xac] ss:$12 sps:$4 sm:$0xff]  }
  0x5e   : > { %2433 = vmatpush1.bf16.msra.mxu1 %v4159_v10  ;;  %v4187_v29 = vld [vmem:[%s4847_s9 + $0x22c] ss:$12 sps:$4 sm:$0xff]   ;;  %v4189_v30 = vld [vmem:[%s4847_s9 + $0xa8] ss:$12 sps:$4 sm:$0xff]   ;;  %v4191_v32 = vld [vmem:[%s4847_s9 + $0xc4] ss:$12 sps:$4 sm:$0xff]  }
  0x5f   : > { %2504 = vmatpush1.bf16.msra.mxu0 %v4160_v11  ;;  %2434 = vmatprep.subr.bf16.mxu1 %v4161_v12  ;;  %v4190_v31 = vld [vmem:[%s4847_s9 + $0x228] ss:$12 sps:$4 sm:$0xff]   ;;  %v4193_v33 = vld [vmem:[%s4847_s9 + $0x244] ss:$12 sps:$4 sm:$0xff]   ;;  %v4195_v34 = vld [vmem:[%s4847_s9 + $0xc0] ss:$12 sps:$4 sm:$0xff]  }
  0x60   : > { %2505 = vmatprep.subr.bf16.mxu0 %v4163_v13  ;;  %v4196_v35 = vld [vmem:[%s4847_s9 + $0x240] ss:$12 sps:$4 sm:$0xff]   ;;  %v4197_v36 = vld [vmem:[%s4847_s9 + $0xdc] ss:$12 sps:$4 sm:$0xff]   ;;  %v4201_v38 = vld [vmem:[%s4847_s9 + $0xd8] ss:$12 sps:$4 sm:$0xff]  }
  0x61   : > { %v4199_v37 = vld [vmem:[%s4847_s9 + $0x25c] ss:$12 sps:$4 sm:$0xff]   ;;  %v4202_v39 = vld [vmem:[%s4847_s9 + $0x258] ss:$12 sps:$4 sm:$0xff]   ;;  %v4203_v40 = vld [vmem:[%s4847_s9 + $0xf4] ss:$12 sps:$4 sm:$0xff]  }
  0x62   : > { %2435 = vmatpush1.bf16.msra.mxu1 %v4165_v14  ;;  %v4205_v41 = vld [vmem:[%s4847_s9 + $0x274] ss:$12 sps:$4 sm:$0xff]   ;;  %v4207_v42 = vld [vmem:[%s4847_s9 + $0xf0] ss:$12 sps:$4 sm:$0xff]   ;;  %v4209_v44 = vld [vmem:[%s4847_s9 + $0x10c] ss:$12 sps:$4 sm:$0xff]  }
  0x63   : > { %2506 = vmatpush1.bf16.msra.mxu0 %v4166_v15  ;;  %2436 = vmatprep.subr.bf16.mxu1 %v4167_v16  ;;  %v4208_v43 = vld [vmem:[%s4847_s9 + $0x270] ss:$12 sps:$4 sm:$0xff]   ;;  %v4211_v45 = vld [vmem:[%s4847_s9 + $0x28c] ss:$12 sps:$4 sm:$0xff]   ;;  %v4213_v46 = vld [vmem:[%s4847_s9 + $0x108] ss:$12 sps:$4 sm:$0xff]  }
  0x64   : > { %2507 = vmatprep.subr.bf16.mxu0 %v4169_v17  ;;  %v4214_v47 = vld [vmem:[%s4847_s9 + $0x288] ss:$12 sps:$4 sm:$0xff]   ;;  %v4215_v48 = vld [vmem:[%s4847_s9 + $0x124] ss:$12 sps:$4 sm:$0xff]   ;;  %v4919_v51 = vld [vmem:[%s5589_s0 + $0xc] ss:$48 sps:$4 sm:$0xff]  }
  0x65   : > { %v4913_v49 = vld [vmem:[%s5589_s0 + $0x4] ss:$48 sps:$4 sm:$0xff]   ;;  %v4219_v52 = vld [vmem:[%s4847_s9 + $0x120] ss:$12 sps:$4 sm:$0xff]   ;;  %2531 = vmatprep.mubr.bf16.mxu0 %v4919_v51  ;;  %v4221_v54 = vld [vmem:[%s4847_s9 + $0x13c] ss:$12 sps:$4 sm:$0xff]  }
  0x66   : > { %2437 = vmatpush1.bf16.msra.mxu1 %v4171_v18  ;;  %v4217_v50 = vld [vmem:[%s4847_s9 + $0x2a4] ss:$12 sps:$4 sm:$0xff]   ;;  %2460 = vmatprep.mubr.bf16.mxu1 %v4913_v49  ;;  %v4220_v53 = vld [vmem:[%s4847_s9 + $0x2a0] ss:$12 sps:$4 sm:$0xff]   ;;  %v4223_v55 = vld [vmem:[%s4847_s9 + $0x2bc] ss:$12 sps:$4 sm:$0xff]  }
  0x67   : > { %2508 = vmatpush1.bf16.msra.mxu0 %v4172_v19  ;;  %2438 = vmatprep.subr.bf16.mxu1 %v4173_v20  ;;  %v4225_v56 = vld [vmem:[%s4847_s9 + $0x138] ss:$12 sps:$4 sm:$0xff]   ;;  %v4227_v58 = vld [vmem:[%s4847_s9 + $0x154] ss:$12 sps:$4 sm:$0xff]   ;;  %v4231_v60 = vld [vmem:[%s4847_s9 + $0x150] ss:$12 sps:$4 sm:$0xff]  }
  0x68   : > { %2509 = vmatprep.subr.bf16.mxu0 %v4175_v21  ;;  %v4226_v57 = vld [vmem:[%s4847_s9 + $0x2b8] ss:$12 sps:$4 sm:$0xff]   ;;  %v4229_v59 = vld [vmem:[%s4847_s9 + $0x2d4] ss:$12 sps:$4 sm:$0xff]   ;;  %v4232_v61 = vld [vmem:[%s4847_s9 + $0x2d0] ss:$12 sps:$4 sm:$0xff]  }
  0x69   : > { %v4233_v62 = vld [vmem:[%s4847_s9 + $0x16c] ss:$12 sps:$4 sm:$0xff]   ;;  %v4237_v0 = vld [vmem:[%s4847_s9 + $0x168] ss:$12 sps:$4 sm:$0xff]   ;;  %v4247_v2 = vld [vmem:[%s4847_s9 + $0x304] ss:$12 sps:$4 sm:$0xff]  }
  0x6a   : > { %2439 = vmatpush1.bf16.msra.mxu1 %v4177_v22  ;;  %v4235_v63 = vld [vmem:[%s4847_s9 + $0x2ec] ss:$12 sps:$4 sm:$0xff]   ;;  %v4238_v1 = vld [vmem:[%s4847_s9 + $0x2e8] ss:$12 sps:$4 sm:$0xff]   ;;  %v4942_v4 = vld [vmem:[%s5589_s0] ss:$48 sps:$4 sm:$0xff]  }
  0x6b   : > { %2510 = vmatpush1.bf16.msra.mxu0 %v4178_v23  ;;  %2440 = vmatprep.subr.bf16.mxu1 %v4179_v24  ;;  %v4248_v3 = vld [vmem:[%s4847_s9 + $0xc8] ss:$12 sps:$4 sm:$0xff]   ;;  %v4245_v6 = vld [vmem:[%s4847_s9 + $0x300] ss:$12 sps:$4 sm:$0xff]   ;;  %v4250_v11 = vld [vmem:[%s4847_s9 + $0x318] ss:$12 sps:$4 sm:$0xff]  }
  0x6c   : > { %2511 = vmatprep.subr.bf16.mxu0 %v4181_v25  ;;  %v4947_v5 = vld [vmem:[%s5589_s0 + $0x8] ss:$48 sps:$4 sm:$0xff]   ;;  %v4253_v9 = vld [vmem:[%s4847_s9 + $0xe0] ss:$12 sps:$4 sm:$0xff]   ;;  %v4956_v10 = vld [vmem:[%s5589_s0 + $0x64] ss:$48 sps:$4 sm:$0xff]  }
  0x6d   : > { %v4249_v7 = vld [vmem:[%s4847_s9 + $0x8] ss:$12 sps:$4 sm:$0xff]   ;;  %v4254_v12 = vld [vmem:[%s4847_s9 + $0x20] ss:$12 sps:$4 sm:$0xff]   ;;  %v4261_v14 = vld [vmem:[%s4847_s9 + $0xf8] ss:$12 sps:$4 sm:$0xff]  }
  0x6e   : > { %2441 = vmatpush1.bf16.msra.mxu1 %v4183_v26  ;;  %v4252_v8 = vld [vmem:[%s4847_s9 + $0x31c] ss:$12 sps:$4 sm:$0xff]   ;;  %v4260_v13 = vld [vmem:[%s4847_s9 + $0x334] ss:$12 sps:$4 sm:$0xff]   ;;  %v4262_v17 = vld [vmem:[%s4847_s9 + $0x38] ss:$12 sps:$4 sm:$0xff]  }
  0x6f   : > { %2512 = vmatpush1.bf16.msra.mxu0 %v4184_v27  ;;  %2442 = vmatprep.subr.bf16.mxu1 %v4185_v28  ;;  %v4968_v15 = vld [vmem:[%s5589_s0 + $0x60] ss:$48 sps:$4 sm:$0xff]   ;;  %v4265_v18 = vld [vmem:[%s4847_s9 + $0x34c] ss:$12 sps:$4 sm:$0xff]   ;;  %v4263_v20 = vld [vmem:[%s4847_s9 + $0x348] ss:$12 sps:$4 sm:$0xff]  }
  0x70   : > { %2513 = vmatprep.subr.bf16.mxu0 %v4187_v29  ;;  %v4258_v16 = vld [vmem:[%s4847_s9 + $0x330] ss:$12 sps:$4 sm:$0xff]   ;;  %v4978_v21 = vld [vmem:[%s5589_s0 + $0xc4] ss:$48 sps:$4 sm:$0xff]   ;;  %v4271_v26 = vld [vmem:[%s4847_s9 + $0x360] ss:$12 sps:$4 sm:$0xff]  }
  0x71   : > { %v4266_v19 = vld [vmem:[%s4847_s9 + $0x110] ss:$12 sps:$4 sm:$0xff]   ;;  %v4274_v25 = vld [vmem:[%s4847_s9 + $0x128] ss:$12 sps:$4 sm:$0xff]   ;;  %v263_v28 = vld [vmem:[%s5589_s0 + $0x120] sm:$0xff] }
  0x72   : > { %2443 = vmatpush1.bf16.msra.mxu1 %v4189_v30  ;;  %v4267_v22 = vld [vmem:[%s4847_s9 + $0x50] ss:$12 sps:$4 sm:$0xff]   ;;  %v4275_v27 = vld [vmem:[%s4847_s9 + $0x68] ss:$12 sps:$4 sm:$0xff]   ;;  %v4279_v30 = vld [vmem:[%s4847_s9 + $0x140] ss:$12 sps:$4 sm:$0xff]  }
  0x73   : > { %2514 = vmatpush1.bf16.msra.mxu0 %v4190_v31  ;;  %2444 = vmatprep.subr.bf16.mxu1 %v4191_v32  ;;  %v4273_v23 = vld [vmem:[%s4847_s9 + $0x364] ss:$12 sps:$4 sm:$0xff]   ;;  %v4278_v29 = vld [vmem:[%s4847_s9 + $0x37c] ss:$12 sps:$4 sm:$0xff]   ;;  %v4998_v32 = vcombine.high %v263_v28, %v263_v28 }
  0x74   : > { %2515 = vmatprep.subr.bf16.mxu0 %v4193_v33  ;;  %v4986_v24 = vld [vmem:[%s5589_s0 + $0xc0] ss:$48 sps:$4 sm:$0xff]   ;;  %v4276_v31 = vld [vmem:[%s4847_s9 + $0x378] ss:$12 sps:$4 sm:$0xff]   ;;  %v5003_v33 = vld [vmem:[%s5589_s0 + $0x6c] ss:$48 sps:$4 sm:$0xff]  }
  0x76   : > { %2445 = vmatpush1.bf16.msra.mxu1 %v4195_v34  ;;  %v4280_v34 = vld [vmem:[%s4847_s9 + $0x80] ss:$12 sps:$4 sm:$0xff]  }
  0x77   : > { %2516 = vmatpush1.bf16.msra.mxu0 %v4196_v35  ;;  %2446 = vmatprep.subr.bf16.mxu1 %v4197_v36  ;;  %v4285_v35 = vld [vmem:[%s4847_s9 + $0x394] ss:$12 sps:$4 sm:$0xff]   ;;  %v4286_v36 = vld [vmem:[%s4847_s9 + $0x158] ss:$12 sps:$4 sm:$0xff]  }
  0x78   : > { %2517 = vmatprep.subr.bf16.mxu0 %v4199_v37  ;;  %v5012_v37 = vld [vmem:[%s5589_s0 + $0x68] ss:$48 sps:$4 sm:$0xff]  }
  0x7a   : > { %2447 = vmatpush1.bf16.msra.mxu1 %v4201_v38  ;;  %v5016_v38 = vcombine.low %v263_v28, %v263_v28  ;;  %v4349_v28 = vld [vmem:[%s4847_s9 + $0x498] ss:$12 sps:$4 sm:$0xff]  }
  0x7b   : > { %2518 = vmatpush1.bf16.msra.mxu0 %v4202_v39  ;;  %2448 = vmatprep.subr.bf16.mxu1 %v4203_v40  ;;  %v4283_v39 = vld [vmem:[%s4847_s9 + $0x390] ss:$12 sps:$4 sm:$0xff]   ;;  %v4287_v40 = vld [vmem:[%s4847_s9 + $0x98] ss:$12 sps:$4 sm:$0xff]  }
  0x7c   : > { %2519 = vmatprep.subr.bf16.mxu0 %v4205_v41  ;;  %v4290_v41 = vld [vmem:[%s4847_s9 + $0x3ac] ss:$12 sps:$4 sm:$0xff]  }
  0x7e   : > { %2449 = vmatpush1.bf16.msra.mxu1 %v4207_v42  ;;  %v4291_v42 = vld [vmem:[%s4847_s9 + $0x170] ss:$12 sps:$4 sm:$0xff]  }
  0x7f   : > { %2520 = vmatpush1.bf16.msra.mxu0 %v4208_v43  ;;  %2450 = vmatprep.subr.bf16.mxu1 %v4209_v44  ;;  %v4288_v43 = vld [vmem:[%s4847_s9 + $0x3a8] ss:$12 sps:$4 sm:$0xff]   ;;  %v5027_v44 = vld [vmem:[%s5589_s0 + $0xcc] ss:$48 sps:$4 sm:$0xff]  }
  0x80   : > { %2521 = vmatprep.subr.bf16.mxu0 %v4211_v45  ;;  %v4292_v45 = vld [vmem:[%s4847_s9 + $0xb0] ss:$12 sps:$4 sm:$0xff]  }
  0x82   : > { %2451 = vmatpush1.bf16.msra.mxu1 %v4213_v46  ;;  %v4295_v46 = vld [vmem:[%s4847_s9 + $0x3c4] ss:$12 sps:$4 sm:$0xff]  }
  0x83   : > { %2522 = vmatpush1.bf16.msra.mxu0 %v4214_v47  ;;  %2452 = vmatprep.subr.bf16.mxu1 %v4215_v48  ;;  %v4296_v47 = vld [vmem:[%s4847_s9 + $0x248] ss:$12 sps:$4 sm:$0xff]  }
  0x84   : > { %2523 = vmatprep.subr.bf16.mxu0 %v4217_v50  ;;  %v5036_v48 = vld [vmem:[%s5589_s0 + $0xc8] ss:$48 sps:$4 sm:$0xff]   ;;  %v4293_v50 = vld [vmem:[%s4847_s9 + $0x3c0] ss:$12 sps:$4 sm:$0xff]  }
  0x86   : > { %2453 = vmatpush1.bf16.msra.mxu1 %v4219_v52  ;;  %v4297_v52 = vld [vmem:[%s4847_s9 + $0x188] ss:$12 sps:$4 sm:$0xff]  }
  0x87   : > { %2524 = vmatpush1.bf16.msra.mxu0 %v4220_v53  ;;  %2454 = vmatprep.subr.bf16.mxu1 %v4221_v54  ;;  %v4300_v53 = vld [vmem:[%s4847_s9 + $0x3dc] ss:$12 sps:$4 sm:$0xff]   ;;  %v4301_v54 = vld [vmem:[%s4847_s9 + $0x260] ss:$12 sps:$4 sm:$0xff]  }
  0x88   : > { %2525 = vmatprep.subr.bf16.mxu0 %v4223_v55  ;;  %v4298_v55 = vld [vmem:[%s4847_s9 + $0x3d8] ss:$12 sps:$4 sm:$0xff]  }
  0x8a   : > { %2455 = vmatpush1.bf16.msra.mxu1 %v4225_v56 }
  0x8b   : > { %2526 = vmatpush1.bf16.msra.mxu0 %v4226_v57  ;;  %2456 = vmatprep.subr.bf16.mxu1 %v4227_v58  ;;  %v4302_v57 = vld [vmem:[%s4847_s9 + $0x1a0] ss:$12 sps:$4 sm:$0xff]  }
  0x8c   : > { %2527 = vmatprep.subr.bf16.mxu0 %v4229_v59  ;;  %v4307_v59 = vld [vmem:[%s4847_s9 + $0x3f4] ss:$12 sps:$4 sm:$0xff]  }
  0x8e   : > { %2457 = vmatpush1.bf16.msra.mxu1 %v4231_v60  ;;  %v4308_v60 = vld [vmem:[%s4847_s9 + $0x278] ss:$12 sps:$4 sm:$0xff]  }
  0x8f   : > { %2528 = vmatpush1.bf16.msra.mxu0 %v4232_v61  ;;  %2458 = vmatprep.subr.bf16.mxu1 %v4233_v62  ;;  %v4305_v61 = vld [vmem:[%s4847_s9 + $0x3f0] ss:$12 sps:$4 sm:$0xff]   ;;  %v4310_v62 = vld [vmem:[%s4847_s9 + $0x1b8] ss:$12 sps:$4 sm:$0xff]  }
  0x90   : > { %2529 = vmatprep.subr.bf16.mxu0 %v4235_v63  ;;  %v4313_v63 = vld [vmem:[%s4847_s9 + $0x40c] ss:$12 sps:$4 sm:$0xff]  }
  0x92   : > { %2459 = vmatpush1.bf16.msra.mxu1 %v4237_v0  ;;  %v4314_v0 = vld [vmem:[%s4847_s9 + $0x290] ss:$12 sps:$4 sm:$0xff]  }
  0x93   : > { %2530 = vmatpush1.bf16.msra.mxu0 %v4238_v1  ;;  %3759 = vmatprep.subr.bf16.mxu1 %v4248_v3  ;;  %v5067_v1 = vld [vmem:[%s5589_s0 + $0x14] ss:$48 sps:$4 sm:$0xff]   ;;  %v4315_v3 = vld [vmem:[%s4847_s9 + $0x1d0] ss:$12 sps:$4 sm:$0xff]  }
  0x94   : > { %2570 = vmatprep.subr.bf16.mxu0 %v4247_v2  ;;  %v4311_v2 = vld [vmem:[%s4847_s9 + $0x408] ss:$12 sps:$4 sm:$0xff]  }
  0x95   : > { %2461 = vmatmul.mubr.bf16.vlgmr.msra.gmra.mrb[0].mxu1 %v4942_v4 }
  0x96   : > { %2532 = vmatmul.mubr.bf16.vlgmr.msra.gmra.mrb[0].mxu0 %v4947_v5  ;;  %3760 = vmatpush3.bf16.msra.mxu1 %v4249_v7  ;;  %v4318_v7 = vld [vmem:[%s4847_s9 + $0x420] ss:$12 sps:$4 sm:$0xff]  }
  0x97   : > { %2571 = vmatpush1.bf16.msra.mxu0 %v4245_v6  ;;  %3761 = vmatprep.subr.bf16.mxu1 %v4253_v9  ;;  %v4321_v6 = vld [vmem:[%s4847_s9 + $0x2a8] ss:$12 sps:$4 sm:$0xff]  }
  0x98   : > { %2572 = vmatprep.subr.bf16.mxu0 %v4252_v8  ;;  %2470 = vmatprep.mubr.bf16.mxu1 %v4956_v10  ;;  %v4323_v8 = vld [vmem:[%s4847_s9 + $0x1e8] ss:$12 sps:$4 sm:$0xff]  }
  0x99   : > { %2541 = vmatprep.mubr.bf16.mxu0 %v5003_v33  ;;  %v4326_v9 = vld [vmem:[%s4847_s9 + $0x43c] ss:$12 sps:$4 sm:$0xff]  }
  0x9a   : > { %3762 = vmatpush3.bf16.msra.mxu1 %v4254_v12  ;;  %v4328_v12 = vld [vmem:[%s4847_s9 + $0x200] ss:$12 sps:$4 sm:$0xff]  }
  0x9b   : > { %2573 = vmatpush1.bf16.msra.mxu0 %v4250_v11  ;;  %3763 = vmatprep.subr.bf16.mxu1 %v4261_v14  ;;  %v4324_v11 = vld [vmem:[%s4847_s9 + $0x438] ss:$12 sps:$4 sm:$0xff]  }
  0x9c   : > { %2574 = vmatprep.subr.bf16.mxu0 %v4260_v13  ;;  %v4332_v13 = vld [vmem:[%s4847_s9 + $0x454] ss:$12 sps:$4 sm:$0xff]   ;;  %v4333_v14 = vld [vmem:[%s4847_s9 + $0x2d8] ss:$12 sps:$4 sm:$0xff]  }
  0x9d   : > { %2471 = vmatmul.mubr.bf16.gmra.mrb[4].mxu1 %v4968_v15 }
  0x9e   : > { %3764 = vmatpush3.bf16.msra.mxu1 %v4262_v17  ;;  %2480 = vmatprep.mubr.bf16.mxu1 %v4978_v21  ;;  %v4338_v17 = vld [vmem:[%s4847_s9 + $0x46c] ss:$12 sps:$4 sm:$0xff]  }
  0x9f   : > { %2575 = vmatpush1.bf16.msra.mxu0 %v4258_v16  ;;  %3765 = vmatprep.subr.bf16.mxu1 %v4266_v19  ;;  %v4335_v16 = vld [vmem:[%s4847_s9 + $0x218] ss:$12 sps:$4 sm:$0xff]   ;;  %v4336_v19 = vld [vmem:[%s4847_s9 + $0x468] ss:$12 sps:$4 sm:$0xff]  }
  0xa0   : > { %2576 = vmatprep.subr.bf16.mxu0 %v4265_v18  ;;  %2542 = vmatmul.mubr.bf16.gmra.mrb[4].mxu0 %v5012_v37  ;;  %v4339_v18 = vld [vmem:[%s4847_s9 + $0x2f0] ss:$12 sps:$4 sm:$0xff]  }
  0xa1   : > { %2551 = vmatprep.mubr.bf16.mxu0 %v5027_v44 }
  0xa2   : > { %3766 = vmatpush3.bf16.msra.mxu1 %v4267_v22  ;;  %v5097_v22 = vld [vmem:[%s5589_s0 + $0x10] ss:$48 sps:$4 sm:$0xff]  }
  0xa3   : > { %2577 = vmatpush1.bf16.msra.mxu0 %v4263_v20  ;;  %3767 = vmatprep.subr.bf16.mxu1 %v4274_v25  ;;  %v4340_v20 = vld [vmem:[%s4847_s9 + $0x230] ss:$12 sps:$4 sm:$0xff]   ;;  %v4348_v25 = vld [vmem:[%s4847_s9 + $0x308] ss:$12 sps:$4 sm:$0xff]  }
  0xa4   : > { %2578 = vmatprep.subr.bf16.mxu0 %v4273_v23  ;;  %v4347_v23 = vld [vmem:[%s4847_s9 + $0x3c8] ss:$12 sps:$4 sm:$0xff]  }
  0xa5   : > { %2481 = vmatmul.mubr.bf16.gmra.mrb[8].mxu1 %v4986_v24 }
  0xa6   : > { %3768 = vmatpush3.bf16.msra.mxu1 %v4275_v27  ;;  %2490 = vmatprep.mubr.bf16.mxu1 %v4998_v32  ;;  %v4352_v27 = vld [vmem:[%s4847_s9 + $0x3e0] ss:$12 sps:$4 sm:$0xff]  }
  0xa7   : > { %2579 = vmatpush1.bf16.msra.mxu0 %v4271_v26  ;;  %3769 = vmatprep.subr.bf16.mxu1 %v4279_v30  ;;  %v4351_v26 = vld [vmem:[%s4847_s9 + $0x49c] ss:$12 sps:$4 sm:$0xff]   ;;  %v4357_v30 = vld [vmem:[%s4847_s9 + $0x3f8] ss:$12 sps:$4 sm:$0xff]  }
  0xa8   : > { %2580 = vmatprep.subr.bf16.mxu0 %v4278_v29  ;;  %2552 = vmatmul.mubr.bf16.gmra.mrb[8].mxu0 %v5036_v48  ;;  %v4356_v29 = vld [vmem:[%s4847_s9 + $0x4b4] ss:$12 sps:$4 sm:$0xff]  }
  0xaa   : > { %3770 = vmatpush3.bf16.msra.mxu1 %v4280_v34  ;;  %v4362_v34 = vld [vmem:[%s4847_s9 + $0x410] ss:$12 sps:$4 sm:$0xff]  }
  0xab   : > { %2581 = vmatpush1.bf16.msra.mxu0 %v4276_v31  ;;  %3771 = vmatprep.subr.bf16.mxu1 %v4286_v36  ;;  %v4354_v31 = vld [vmem:[%s4847_s9 + $0x4b0] ss:$12 sps:$4 sm:$0xff]  }
  0xac   : > { %2582 = vmatprep.subr.bf16.mxu0 %v4285_v35  ;;  %v4359_v35 = vld [vmem:[%s4847_s9 + $0x4c8] ss:$12 sps:$4 sm:$0xff]   ;;  %v4363_v36 = vld [vmem:[%s4847_s9 + $0x350] ss:$12 sps:$4 sm:$0xff]  }
  0xad   : > { %2491 = vmatmul.mubr.bf16.gmra.mrb[12].mxu1 %v5016_v38 }
  0xae   : > { %3772 = vmatpush3.bf16.msra.mxu1 %v4287_v40  ;;  %2886 = vmatprep.mubr.bf16.mxu1 %v4913_v49  ;;  %v264_v49 = vld [vmem:[%s5589_s0 + $0x128] sm:$0xff] }
  0xaf   : > { %2583 = vmatpush1.bf16.msra.mxu0 %v4283_v39  ;;  %3773 = vmatprep.subr.bf16.mxu1 %v4291_v42  ;;  %v5049_v56 = vcombine.high %v264_v49, %v264_v49  ;;  %v5053_v58 = vcombine.low %v264_v49, %v264_v49  ;;  %v4367_v39 = vld [vmem:[%s4847_s9 + $0x428] ss:$12 sps:$4 sm:$0xff]   ;;  %v4364_v40 = vld [vmem:[%s4847_s9 + $0x4e0] ss:$12 sps:$4 sm:$0xff]   ;;  %v4382_v49 = vld [vmem:[%s4847_s9 + $0x470] ss:$12 sps:$4 sm:$0xff]  }
  0xb0   : > { %2584 = vmatprep.subr.bf16.mxu0 %v4290_v41  ;;  %v4368_v41 = vld [vmem:[%s4847_s9 + $0x368] ss:$12 sps:$4 sm:$0xff]  }
  0xb1   : > { %2561 = vmatprep.mubr.bf16.mxu0 %v5049_v56  ;;  %v4371_v42 = vld [vmem:[%s4847_s9 + $0x4fc] ss:$12 sps:$4 sm:$0xff]  }
  0xb2   : > { %3774 = vmatpush3.bf16.msra.mxu1 %v4292_v45  ;;  %2562 = vmatmul.mubr.bf16.gmra.mrb[12].mxu0 %v5053_v58  ;;  %v4369_v45 = vld [vmem:[%s4847_s9 + $0x4f8] ss:$12 sps:$4 sm:$0xff]  }
  0xb3   : > { %2585 = vmatpush1.bf16.msra.mxu0 %v4288_v43  ;;  %3799 = vmatprep.subr.bf16.mxu1 %v4296_v47  ;;  %v4372_v43 = vld [vmem:[%s4847_s9 + $0x440] ss:$12 sps:$4 sm:$0xff]  }
  0xb4   : > { %2586 = vmatprep.subr.bf16.mxu0 %v4295_v46  ;;  %2602 = vmatprep.mubr.bf16.mxu0 %v5067_v1  ;;  %v5144_v46 = vld [vmem:[%s5589_s0 + $0xd4] ss:$48 sps:$4 sm:$0xff]  }
  0xb5   : > { %2887 = vmatmul.mubr.bf16.vlgmr.msra.gmra.mrb[16].mxu1 %v4942_v4  ;;  %v4320_v4 = vld [vmem:[%s4847_s9 + $0x424] ss:$12 sps:$4 sm:$0xff]   ;;  %v4376_v47 = vld [vmem:[%s4847_s9 + $0x514] ss:$12 sps:$4 sm:$0xff]  }
  0xb6   : > { %3800 = vmatpush3.bf16.msra.mxu1 %v4297_v52  ;;  %2894 = vmatprep.mubr.bf16.mxu1 %v4956_v10  ;;  %v4327_v10 = vld [vmem:[%s4847_s9 + $0x2c0] ss:$12 sps:$4 sm:$0xff]  }
  0xb7   : > { %2587 = vmatpush1.bf16.msra.mxu0 %v4293_v50  ;;  %3801 = vmatprep.subr.bf16.mxu1 %v4301_v54  ;;  %v4377_v50 = vld [vmem:[%s4847_s9 + $0x458] ss:$12 sps:$4 sm:$0xff]   ;;  %v5151_v52 = vld [vmem:[%s5589_s0 + $0xd0] ss:$48 sps:$4 sm:$0xff]  }
  0xb8   : > { %2588 = vmatprep.subr.bf16.mxu0 %v4300_v53  ;;  %v4378_v53 = vld [vmem:[%s4847_s9 + $0x398] ss:$12 sps:$4 sm:$0xff]  }
  0xb9   : > { %v4381_v54 = vld [vmem:[%s4847_s9 + $0x52c] ss:$12 sps:$4 sm:$0xff]  }
  0xba   : > { %3802 = vmatpush3.bf16.msra.mxu1 %v4302_v57  ;;  %v4383_v57 = vld [vmem:[%s4847_s9 + $0x3b0] ss:$12 sps:$4 sm:$0xff]  }
  0xbb   : > { %2589 = vmatpush1.bf16.msra.mxu0 %v4298_v55  ;;  %3803 = vmatprep.subr.bf16.mxu1 %v4308_v60  ;;  %v4379_v55 = vld [vmem:[%s4847_s9 + $0x528] ss:$12 sps:$4 sm:$0xff]  }
  0xbc   : > { %2590 = vmatprep.subr.bf16.mxu0 %v4307_v59  ;;  %v4386_v59 = vld [vmem:[%s4847_s9 + $0x544] ss:$12 sps:$4 sm:$0xff]  }
  0xbd   : > { %2895 = vmatmul.mubr.bf16.gmra.mrb[20].mxu1 %v4968_v15  ;;  %v4330_v15 = vld [vmem:[%s4847_s9 + $0x450] ss:$12 sps:$4 sm:$0xff]  }
  0xbe   : > { %3804 = vmatpush3.bf16.msra.mxu1 %v4310_v62  ;;  %2902 = vmatprep.mubr.bf16.mxu1 %v4978_v21  ;;  %v4346_v21 = vld [vmem:[%s4847_s9 + $0x484] ss:$12 sps:$4 sm:$0xff]   ;;  %v4387_v62 = vld [vmem:[%s4847_s9 + $0x548] ss:$12 sps:$4 sm:$0xff]  }
  0xbf   : > { %2591 = vmatpush1.bf16.msra.mxu0 %v4305_v61  ;;  %3805 = vmatprep.subr.bf16.mxu1 %v4314_v0  ;;  %v4391_v0 = vld [vmem:[%s4847_s9 + $0x55c] ss:$12 sps:$4 sm:$0xff]  }
  0xc0   : > { %2592 = vmatprep.subr.bf16.mxu0 %v4313_v63  ;;  %v4388_v63 = vld [vmem:[%s4847_s9 + $0x488] ss:$12 sps:$4 sm:$0xff]  }
  0xc2   : > { %3806 = vmatpush3.bf16.msra.mxu1 %v4315_v3  ;;  %v5181_v3 = vld [vmem:[%s5589_s0 + $0x1c] ss:$48 sps:$4 sm:$0xff]  }
  0xc3   : > { %2593 = vmatpush1.bf16.msra.mxu0 %v4311_v2  ;;  %3807 = vmatprep.subr.bf16.mxu1 %v4321_v6  ;;  %v4392_v2 = vld [vmem:[%s4847_s9 + $0x560] ss:$12 sps:$4 sm:$0xff]  }
  0xc4   : > { %2594 = vmatprep.subr.bf16.mxu0 %v4320_v4  ;;  %v4393_v4 = vld [vmem:[%s4847_s9 + $0x4a0] ss:$12 sps:$4 sm:$0xff]  }
  0xc5   : > { %2903 = vmatmul.mubr.bf16.gmra.mrb[24].mxu1 %v4986_v24  ;;  %v4344_v24 = vld [vmem:[%s4847_s9 + $0x480] ss:$12 sps:$4 sm:$0xff]  }
  0xc6   : > { %3808 = vmatpush3.bf16.msra.mxu1 %v4323_v8  ;;  %2910 = vmatprep.mubr.bf16.mxu1 %v4998_v32  ;;  %v4358_v32 = vld [vmem:[%s4847_s9 + $0x338] ss:$12 sps:$4 sm:$0xff]   ;;  %v4398_v6 = vld [vmem:[%s4847_s9 + $0x574] ss:$12 sps:$4 sm:$0xff]   ;;  %v4396_v8 = vld [vmem:[%s4847_s9 + $0x570] ss:$12 sps:$4 sm:$0xff]  }
  0xc7   : > { %2595 = vmatpush1.bf16.msra.mxu0 %v4318_v7  ;;  %3809 = vmatprep.subr.bf16.mxu1 %v4327_v10  ;;  %v4400_v7 = vld [vmem:[%s4847_s9 + $0x578] ss:$12 sps:$4 sm:$0xff]  }
  0xc8   : > { %2596 = vmatprep.subr.bf16.mxu0 %v4326_v9  ;;  %v4401_v9 = vld [vmem:[%s4847_s9 + $0x4b8] ss:$12 sps:$4 sm:$0xff]  }
  0xc9   : > { %v4404_v10 = vld [vmem:[%s4847_s9 + $0x58c] ss:$12 sps:$4 sm:$0xff]  }
  0xca   : > { %3810 = vmatpush3.bf16.msra.mxu1 %v4328_v12  ;;  %v4402_v12 = vld [vmem:[%s4847_s9 + $0x588] ss:$12 sps:$4 sm:$0xff]  }
  0xcb   : > { %2597 = vmatpush1.bf16.msra.mxu0 %v4324_v11  ;;  %3811 = vmatprep.subr.bf16.mxu1 %v4333_v14  ;;  %v4405_v11 = vld [vmem:[%s4847_s9 + $0x590] ss:$12 sps:$4 sm:$0xff]  }
  0xcc   : > { %2598 = vmatprep.subr.bf16.mxu0 %v4332_v13  ;;  %v4406_v13 = vld [vmem:[%s4847_s9 + $0x4d0] ss:$12 sps:$4 sm:$0xff]  }
  0xcd   : > { %2911 = vmatmul.mubr.bf16.gmra.mrb[28].mxu1 %v5016_v38  ;;  %v4366_v38 = vld [vmem:[%s4847_s9 + $0x4e4] ss:$12 sps:$4 sm:$0xff]  }
  0xce   : > { %3812 = vmatpush3.bf16.msra.mxu1 %v4335_v16  ;;  %2950 = vmatprep.mubr.bf16.mxu1 %v4919_v51  ;;  %v4353_v51 = vld [vmem:[%s4847_s9 + $0x320] ss:$12 sps:$4 sm:$0xff]   ;;  %v4411_v14 = vld [vmem:[%s4847_s9 + $0x5a4] ss:$12 sps:$4 sm:$0xff]  }
  0xcf   : > { %2599 = vmatpush1.bf16.msra.mxu0 %v4330_v15  ;;  %3813 = vmatprep.subr.bf16.mxu1 %v4339_v18  ;;  %v4413_v15 = vld [vmem:[%s4847_s9 + $0x5a8] ss:$12 sps:$4 sm:$0xff]   ;;  %v4409_v16 = vld [vmem:[%s4847_s9 + $0x5a0] ss:$12 sps:$4 sm:$0xff]  }
  0xd0   : > { %2600 = vmatprep.subr.bf16.mxu0 %v4338_v17  ;;  %v4414_v17 = vld [vmem:[%s4847_s9 + $0x4e8] ss:$12 sps:$4 sm:$0xff]  }
  0xd1   : > { %v4417_v18 = vld [vmem:[%s4847_s9 + $0x5bc] ss:$12 sps:$4 sm:$0xff]  }
  0xd2   : > { %3814 = vmatpush3.bf16.msra.mxu1 %v4340_v20  ;;  %v4415_v20 = vld [vmem:[%s4847_s9 + $0x5b8] ss:$12 sps:$4 sm:$0xff]  }
  0xd3   : > { %2601 = vmatpush1.bf16.msra.mxu0 %v4336_v19  ;;  %3839 = vmatprep.subr.bf16.mxu1 %v4347_v23  ;;  %v4418_v19 = vld [vmem:[%s4847_s9 + $0x5c0] ss:$12 sps:$4 sm:$0xff]   ;;  %v4425_v23 = vld [vmem:[%s4847_s9 + $0x5d8] ss:$12 sps:$4 sm:$0xff]  }
  0xd4   : > { %2641 = vmatprep.subr.bf16.mxu0 %v4346_v21  ;;  %v4419_v21 = vld [vmem:[%s4847_s9 + $0x500] ss:$12 sps:$4 sm:$0xff]  }
  0xd5   : > { %2951 = vmatmul.mubr.bf16.vlgmr.msra.gmra.mrb[32].mxu1 %v4947_v5  ;;  %v4361_v5 = vld [vmem:[%s4847_s9 + $0x4cc] ss:$12 sps:$4 sm:$0xff]  }
  0xd6   : > { %2603 = vmatmul.mubr.bf16.vlgmr.msra.gmra.mrb[0].mxu0 %v5097_v22  ;;  %3840 = vmatpush3.bf16.msra.mxu1 %v4348_v25  ;;  %v4426_v25 = vld [vmem:[%s4847_s9 + $0x518] ss:$12 sps:$4 sm:$0xff]  }
  0xd7   : > { %2642 = vmatpush1.bf16.msra.mxu0 %v4344_v24  ;;  %3841 = vmatprep.subr.bf16.mxu1 %v4352_v27  ;;  %v4421_v24 = vld [vmem:[%s4847_s9 + $0x5d0] ss:$12 sps:$4 sm:$0xff]  }
  0xd8   : > { %2643 = vmatprep.subr.bf16.mxu0 %v4351_v26  ;;  %2958 = vmatprep.mubr.bf16.mxu1 %v5003_v33  ;;  %v5122_v33 = vld [vmem:[%s5589_s0 + $0x74] ss:$48 sps:$4 sm:$0xff]   ;;  %v4429_v26 = vld [vmem:[%s4847_s9 + $0x5ec] ss:$12 sps:$4 sm:$0xff]   ;;  %v4430_v27 = vld [vmem:[%s4847_s9 + $0x5f0] ss:$12 sps:$4 sm:$0xff]  }
  0xd9   : > { %2612 = vmatprep.mubr.bf16.mxu0 %v5122_v33 }
  0xda   : > { %3842 = vmatpush3.bf16.msra.mxu1 %v4353_v51  ;;  %v4431_v51 = vld [vmem:[%s4847_s9 + $0x530] ss:$12 sps:$4 sm:$0xff]  }
  0xdb   : > { %2644 = vmatpush1.bf16.msra.mxu0 %v4349_v28  ;;  %3843 = vmatprep.subr.bf16.mxu1 %v4357_v30  ;;  %v4427_v28 = vld [vmem:[%s4847_s9 + $0x5e8] ss:$12 sps:$4 sm:$0xff]  }
  0xdc   : > { %2645 = vmatprep.subr.bf16.mxu0 %v4356_v29  ;;  %v4437_v29 = vld [vmem:[%s4847_s9 + $0x604] ss:$12 sps:$4 sm:$0xff]   ;;  %v4432_v30 = vld [vmem:[%s5589_s0 + $0x18] ss:$48 sps:$4 sm:$0xff]  }
  0xdd   : > { %2959 = vmatmul.mubr.bf16.gmra.mrb[36].mxu1 %v5012_v37  ;;  %v5129_v37 = vld [vmem:[%s5589_s0 + $0x70] ss:$48 sps:$4 sm:$0xff]  }
  0xde   : > { %3844 = vmatpush3.bf16.msra.mxu1 %v4358_v32  ;;  %2966 = vmatprep.mubr.bf16.mxu1 %v5027_v44  ;;  %v4373_v44 = vld [vmem:[%s4847_s9 + $0x380] ss:$12 sps:$4 sm:$0xff]  }
  0xdf   : > { %2646 = vmatpush1.bf16.msra.mxu0 %v4354_v31  ;;  %3845 = vmatprep.subr.bf16.mxu1 %v4362_v34  ;;  %v4438_v31 = vld [vmem:[%s4847_s9 + $0x6c8] ss:$12 sps:$4 sm:$0xff]   ;;  %v4435_v32 = vld [vmem:[%s4847_s9 + $0x600] ss:$12 sps:$4 sm:$0xff]  }
  0xe0   : > { %2647 = vmatprep.subr.bf16.mxu0 %v4361_v5  ;;  %2613 = vmatmul.mubr.bf16.gmra.mrb[4].mxu0 %v5129_v37  ;;  %v4439_v5 = vld [vmem:[%s4847_s9 + $0x608] ss:$12 sps:$4 sm:$0xff]  }
  0xe1   : > { %2622 = vmatprep.mubr.bf16.mxu0 %v5144_v46  ;;  %v4442_v34 = vld [vmem:[%s4847_s9 + $0x61c] ss:$12 sps:$4 sm:$0xff]  }
  0xe2   : > { %3846 = vmatpush3.bf16.msra.mxu1 %v4363_v36  ;;  %v4445_v36 = vld [vmem:[%s5589_s0 + $0x7c] ss:$48 sps:$4 sm:$0xff]  }
  0xe3   : > { %2648 = vmatpush1.bf16.msra.mxu0 %v4359_v35  ;;  %3847 = vmatprep.subr.bf16.mxu1 %v4367_v39  ;;  %v4443_v35 = vld [vmem:[%s4847_s9 + $0x6e0] ss:$12 sps:$4 sm:$0xff]  }
  0xe4   : > { %2649 = vmatprep.subr.bf16.mxu0 %v4366_v38  ;;  %v4444_v38 = vld [vmem:[%s4847_s9 + $0x620] ss:$12 sps:$4 sm:$0xff]  }
  0xe5   : > { %2967 = vmatmul.mubr.bf16.gmra.mrb[40].mxu1 %v5036_v48  ;;  %v4374_v48 = vld [vmem:[%s4847_s9 + $0x510] ss:$12 sps:$4 sm:$0xff]   ;;  %v4449_v39 = vld [vmem:[%s4847_s9 + $0x634] ss:$12 sps:$4 sm:$0xff]  }
  0xe6   : > { %3848 = vmatpush3.bf16.msra.mxu1 %v4368_v41  ;;  %2974 = vmatprep.mubr.bf16.mxu1 %v5049_v56  ;;  %v265_v56 = vld [vmem:[%s5589_s0 + $0x130] sm:$0xff]  ;;  %v4450_v41 = vld [vmem:[%s5589_s0 + $0x78] ss:$48 sps:$4 sm:$0xff]  }
  0xe7   : > { %2650 = vmatpush1.bf16.msra.mxu0 %v4364_v40  ;;  %3849 = vmatprep.subr.bf16.mxu1 %v4372_v43  ;;  %v3458_v60 = vcombine.high %v265_v56, %v265_v56  ;;  %v5167_v61 = vcombine.low %v265_v56, %v265_v56  ;;  %v4447_v40 = vld [vmem:[%s4847_s9 + $0x630] ss:$12 sps:$4 sm:$0xff]   ;;  %v4455_v43 = vld [vmem:[%s4847_s9 + $0x64c] ss:$12 sps:$4 sm:$0xff]  }
  0xe8   : > { %2651 = vmatprep.subr.bf16.mxu0 %v4371_v42  ;;  %2623 = vmatmul.mubr.bf16.gmra.mrb[8].mxu0 %v5151_v52  ;;  %v4452_v42 = vld [vmem:[%s4847_s9 + $0x638] ss:$12 sps:$4 sm:$0xff]   ;;  %v4469_v56 = vld [vmem:[%s4847_s9 + $0x740] ss:$12 sps:$4 sm:$0xff]  }
  0xe9   : > { %2632 = vmatprep.mubr.bf16.mxu0 %v3458_v60 }
  0xea   : > { %3850 = vmatpush3.bf16.msra.mxu1 %v4373_v44  ;;  %v4458_v44 = vld [vmem:[%s5589_s0 + $0xdc] ss:$48 sps:$4 sm:$0xff]  }
  0xeb   : > { %2652 = vmatpush1.bf16.msra.mxu0 %v4369_v45  ;;  %3851 = vmatprep.subr.bf16.mxu1 %v4377_v50  ;;  %v4456_v45 = vld [vmem:[%s4847_s9 + $0x710] ss:$12 sps:$4 sm:$0xff]  }
  0xec   : > { %2653 = vmatprep.subr.bf16.mxu0 %v4376_v47  ;;  %v4457_v47 = vld [vmem:[%s4847_s9 + $0x650] ss:$12 sps:$4 sm:$0xff]  }
  0xed   : > { %2975 = vmatmul.mubr.bf16.gmra.mrb[44].mxu1 %v5053_v58  ;;  %v4384_v58 = vld [vmem:[%s4847_s9 + $0x540] ss:$12 sps:$4 sm:$0xff]   ;;  %v4462_v50 = vld [vmem:[%s4847_s9 + $0x664] ss:$12 sps:$4 sm:$0xff]  }
  0xee   : > { %3852 = vmatpush3.bf16.msra.mxu1 %v4378_v53  ;;  %3014 = vmatprep.mubr.bf16.mxu1 %v5067_v1  ;;  %v4389_v1 = vld [vmem:[%s4847_s9 + $0x558] ss:$12 sps:$4 sm:$0xff]   ;;  %v4460_v53 = vld [vmem:[%s4847_s9 + $0x660] ss:$12 sps:$4 sm:$0xff]  }
  0xef   : > { %2654 = vmatpush1.bf16.msra.mxu0 %v4374_v48  ;;  %3853 = vmatprep.subr.bf16.mxu1 %v4382_v49  ;;  %v4464_v48 = vld [vmem:[%s4847_s9 + $0x728] ss:$12 sps:$4 sm:$0xff]   ;;  %v266_v49 = vld [vmem:[%s5589_s0 + $0x138] sm:$0xff] }
  0xf0   : > { %2655 = vmatprep.subr.bf16.mxu0 %v4381_v54  ;;  %2633 = vmatmul.mubr.bf16.gmra.mrb[12].mxu0 %v5167_v61  ;;  %v4465_v54 = vld [vmem:[%s4847_s9 + $0x668] ss:$12 sps:$4 sm:$0xff]  }
  0xf1   : > { %2673 = vmatprep.mubr.bf16.mxu0 %v5181_v3 }
  0xf2   : > { %3854 = vmatpush3.bf16.msra.mxu1 %v4383_v57  ;;  %v3460_v57 = vcombine.high %v266_v49, %v266_v49 }
  0xf3   : > { %2656 = vmatpush1.bf16.msra.mxu0 %v4379_v55  ;;  %3879 = vmatprep.subr.bf16.mxu1 %v4387_v62  ;;  %v4468_v55 = vld [vmem:[%s4847_s9 + $0x67c] ss:$12 sps:$4 sm:$0xff]   ;;  %v4476_v62 = vld [vmem:[%s4847_s9 + $0x758] ss:$12 sps:$4 sm:$0xff]  }
  0xf4   : > { %2657 = vmatprep.subr.bf16.mxu0 %v4386_v59  ;;  %v4466_v59 = vld [vmem:[%s4847_s9 + $0x678] ss:$12 sps:$4 sm:$0xff]  }
  0xf5   : > { %3015 = vmatmul.mubr.bf16.vlgmr.msra.gmra.mrb[48].mxu1 %v5097_v22  ;;  %v4423_v22 = vld [vmem:[%s4847_s9 + $0x5d4] ss:$12 sps:$4 sm:$0xff]  }
  0xf6   : > { %3880 = vmatpush3.bf16.msra.mxu1 %v4388_v63  ;;  %3022 = vmatprep.mubr.bf16.mxu1 %v5122_v33  ;;  %v4440_v33 = vld [vmem:[%s4847_s9 + $0x618] ss:$12 sps:$4 sm:$0xff]   ;;  %v3459_v63 = vcombine.low %v266_v49, %v266_v49 }
  0xf7   : > { %2658 = vmatpush1.bf16.msra.mxu0 %v4384_v58  ;;  %3881 = vmatprep.subr.bf16.mxu1 %v4392_v2  ;;  %v4472_v58 = vld [vmem:[%s4847_s9 + $0x690] ss:$12 sps:$4 sm:$0xff]   ;;  %v4480_v2 = vld [vmem:[%s4847_s9 + $0x6ac] ss:$12 sps:$4 sm:$0xff]  }
  0xf8   : > { %2659 = vmatprep.subr.bf16.mxu0 %v4391_v0  ;;  %v4477_v0 = vld [vmem:[%s4847_s9 + $0x698] ss:$12 sps:$4 sm:$0xff]  }
  0xf9   : > { %v4539_v49 = vld [vmem:[%s4847_s9 + $0x784] ss:$12 sps:$4 sm:$0xff]  }
  0xfa   : > { %3882 = vmatpush3.bf16.msra.mxu1 %v4393_v4  ;;  %v4485_v4 = vld [vmem:[%s5589_s0 + $0x24] ss:$48 sps:$4 sm:$0xff]  }
  0xfb   : > { %2660 = vmatpush1.bf16.msra.mxu0 %v4389_v1  ;;  %3883 = vmatprep.subr.bf16.mxu1 %v4400_v7  ;;  %v4481_v1 = vld [vmem:[%s4847_s9 + $0x770] ss:$12 sps:$4 sm:$0xff]  }
  0xfc   : > { %2661 = vmatprep.subr.bf16.mxu0 %v4398_v6  ;;  %v4482_v6 = vld [vmem:[%s4847_s9 + $0x6b0] ss:$12 sps:$4 sm:$0xff]  }
  0xfd   : > { %3023 = vmatmul.mubr.bf16.gmra.mrb[52].mxu1 %v5129_v37  ;;  %v4451_v37 = vld [vmem:[%s4847_s9 + $0x6f8] ss:$12 sps:$4 sm:$0xff]  }
  0xfe   : > { %3884 = vmatpush3.bf16.msra.mxu1 %v4401_v9  ;;  %3030 = vmatprep.mubr.bf16.mxu1 %v5144_v46  ;;  %v4453_v46 = vld [vmem:[%s4847_s9 + $0x648] ss:$12 sps:$4 sm:$0xff]   ;;  %v4488_v7 = vld [vmem:[%s4847_s9 + $0x6c4] ss:$12 sps:$4 sm:$0xff]  }
  0xff   : > { %2662 = vmatpush1.bf16.msra.mxu0 %v4396_v8  ;;  %3885 = vmatprep.subr.bf16.mxu1 %v4405_v11  ;;  %v4489_v8 = vld [vmem:[%s4847_s9 + $0x848] ss:$12 sps:$4 sm:$0xff]   ;;  %v5273_v9 = vld [vmem:[%s5589_s0 + $0x20] ss:$48 sps:$4 sm:$0xff]  }
 0x100   : > { %2663 = vmatprep.subr.bf16.mxu0 %v4404_v10  ;;  %v4486_v10 = vld [vmem:[%s4847_s9 + $0x6c0] ss:$12 sps:$4 sm:$0xff]   ;;  %v4490_v11 = vld [vmem:[%s4847_s9 + $0x788] ss:$12 sps:$4 sm:$0xff]  }
 0x102   : > { %3886 = vmatpush3.bf16.msra.mxu1 %v4406_v13  ;;  %v4494_v13 = vld [vmem:[%s4847_s9 + $0x860] ss:$12 sps:$4 sm:$0xff]  }
 0x103   : > { %2664 = vmatpush1.bf16.msra.mxu0 %v4402_v12  ;;  %3887 = vmatprep.subr.bf16.mxu1 %v4413_v15  ;;  %v4493_v12 = vld [vmem:[%s4847_s9 + $0x6dc] ss:$12 sps:$4 sm:$0xff]   ;;  %v5283_v15 = vld [vmem:[%s5589_s0 + $0x84] ss:$48 sps:$4 sm:$0xff]  }
 0x104   : > { %2665 = vmatprep.subr.bf16.mxu0 %v4411_v14  ;;  %v4491_v14 = vld [vmem:[%s4847_s9 + $0x6d8] ss:$12 sps:$4 sm:$0xff]  }
 0x105   : > { %3031 = vmatmul.mubr.bf16.gmra.mrb[56].mxu1 %v5151_v52  ;;  %v4463_v52 = vld [vmem:[%s5589_s0 + $0xd8] ss:$48 sps:$4 sm:$0xff]  }
 0x106   : > { %3888 = vmatpush3.bf16.msra.mxu1 %v4414_v17  ;;  %3038 = vmatprep.mubr.bf16.mxu1 %v3458_v60  ;;  %v4470_v60 = vld [vmem:[%s4847_s9 + $0x680] ss:$12 sps:$4 sm:$0xff]  }
 0x107   : > { %2666 = vmatpush1.bf16.msra.mxu0 %v4409_v16  ;;  %3889 = vmatprep.subr.bf16.mxu1 %v4418_v19  ;;  %v4495_v16 = vld [vmem:[%s4847_s9 + $0x7a0] ss:$12 sps:$4 sm:$0xff]   ;;  %v4498_v19 = vld [vmem:[%s4847_s9 + $0x6f0] ss:$12 sps:$4 sm:$0xff]  }
 0x108   : > { %2667 = vmatprep.subr.bf16.mxu0 %v4417_v18  ;;  %v4500_v17 = vld [vmem:[%s4847_s9 + $0x6f4] ss:$12 sps:$4 sm:$0xff]   ;;  %v4502_v18 = vld [vmem:[%s4847_s9 + $0x878] ss:$12 sps:$4 sm:$0xff]  }
 0x10a   : > { %3890 = vmatpush3.bf16.msra.mxu1 %v4419_v21  ;;  %v4503_v21 = vld [vmem:[%s4847_s9 + $0x7b8] ss:$12 sps:$4 sm:$0xff]  }
 0x10b   : > { %2668 = vmatpush1.bf16.msra.mxu0 %v4415_v20  ;;  %3891 = vmatprep.subr.bf16.mxu1 %v4425_v23  ;;  %v5294_v20 = vld [vmem:[%s5589_s0 + $0x80] ss:$48 sps:$4 sm:$0xff]  }
 0x10c   : > { %2669 = vmatprep.subr.bf16.mxu0 %v4423_v22  ;;  %v4506_v22 = vld [vmem:[%s4847_s9 + $0x70c] ss:$12 sps:$4 sm:$0xff]   ;;  %v4507_v23 = vld [vmem:[%s4847_s9 + $0x890] ss:$12 sps:$4 sm:$0xff]  }
 0x10d   : > { %3039 = vmatmul.mubr.bf16.gmra.mrb[60].mxu1 %v5167_v61  ;;  %v4474_v61 = vld [vmem:[%s4847_s9 + $0x694] ss:$12 sps:$4 sm:$0xff]  }
 0x10e   : > { %3892 = vmatpush3.bf16.msra.mxu1 %v4426_v25  ;;  %3078 = vmatprep.mubr.bf16.mxu1 %v5181_v3  ;;  %v4478_v3 = vld [vmem:[%s4847_s9 + $0x6a8] ss:$12 sps:$4 sm:$0xff]  }
 0x10f   : > { %2670 = vmatpush1.bf16.msra.mxu0 %v4421_v24  ;;  %3893 = vmatprep.subr.bf16.mxu1 %v4430_v27  ;;  %v5302_v24 = vld [vmem:[%s5589_s0 + $0xe4] ss:$48 sps:$4 sm:$0xff]  }
 0x110   : > { %2671 = vmatprep.subr.bf16.mxu0 %v4429_v26  ;;  %v4504_v25 = vld [vmem:[%s4847_s9 + $0x708] ss:$12 sps:$4 sm:$0xff]   ;;  %v4508_v26 = vld [vmem:[%s4847_s9 + $0x7d0] ss:$12 sps:$4 sm:$0xff]  }
 0x111   : > { %v4513_v27 = vld [vmem:[%s4847_s9 + $0x724] ss:$12 sps:$4 sm:$0xff]  }
 0x112   : > { %3894 = vmatpush3.bf16.msra.mxu1 %v4431_v51  ;;  %v5313_v51 = vld [vmem:[%s5589_s0 + $0xe0] ss:$48 sps:$4 sm:$0xff]  }
 0x113   : > { %2672 = vmatpush1.bf16.msra.mxu0 %v4427_v28  ;;  %3919 = vmatprep.subr.bf16.mxu1 %v4438_v31  ;;  %v4515_v28 = vld [vmem:[%s4847_s9 + $0x8a8] ss:$12 sps:$4 sm:$0xff]   ;;  %v4511_v31 = vld [vmem:[%s4847_s9 + $0x720] ss:$12 sps:$4 sm:$0xff]  }
 0x114   : > { %2712 = vmatprep.subr.bf16.mxu0 %v4437_v29  ;;  %v267_v29 = vld [vmem:[%s5589_s0 + $0x140] sm:$0xff] }
 0x115   : > { %3079 = vmatmul.mubr.bf16.vlgmr.msra.gmra.mrb[64].mxu1 %v4432_v30 }
 0x116   : > { %2674 = vmatmul.mubr.bf16.vlgmr.msra.gmra.mrb[0].mxu0 %v4432_v30  ;;  %3920 = vmatpush3.bf16.msra.mxu1 %v4439_v5  ;;  %v655_v30 = vlaneseq  ;;  %v4519_v5 = vld [vmem:[%s4847_s9 + $0x73c] ss:$12 sps:$4 sm:$0xff]  }
 0x117   : > { %2713 = vmatpush1.bf16.msra.mxu0 %v4435_v32  ;;  %3921 = vmatprep.subr.bf16.mxu1 %v4443_v35  ;;  %v4516_v32 = vld [vmem:[%s4847_s9 + $0x7e8] ss:$12 sps:$4 sm:$0xff]   ;;  %v5322_v35 = vcombine.high %v267_v29, %v267_v29 }
 0x118   : > { %2714 = vmatprep.subr.bf16.mxu0 %v4442_v34  ;;  %3086 = vmatprep.mubr.bf16.mxu1 %v4445_v36  ;;  %v4520_v34 = vld [vmem:[%s4847_s9 + $0x8c0] ss:$12 sps:$4 sm:$0xff]  }
 0x119   : > { %2683 = vmatprep.mubr.bf16.mxu0 %v4445_v36  ;;  %v5325_v36 = vshrl.u32 %v655_v30, 7 }
 0x11a   : > { %3922 = vmatpush3.bf16.msra.mxu1 %v4444_v38  ;;  %v4521_v38 = vld [vmem:[%s4847_s9 + $0x800] ss:$12 sps:$4 sm:$0xff]  }
 0x11b   : > { %2715 = vmatpush1.bf16.msra.mxu0 %v4440_v33  ;;  %3923 = vmatprep.subr.bf16.mxu1 %v4451_v37  ;;  %v4517_v33 = vld [vmem:[%s4847_s9 + $0x738] ss:$12 sps:$4 sm:$0xff]  }
 0x11c   : > { %2716 = vmatprep.subr.bf16.mxu0 %v4449_v39  ;;  %v4525_v39 = vld [vmem:[%s4847_s9 + $0x754] ss:$12 sps:$4 sm:$0xff]   ;;  %v4527_v37 = vld [vmem:[%s4847_s9 + $0x8d8] ss:$12 sps:$4 sm:$0xff]  }
 0x11d   : > { %3087 = vmatmul.mubr.bf16.gmra.mrb[68].mxu1 %v4450_v41 }
 0x11e   : > { %2684 = vmatmul.mubr.bf16.gmra.mrb[4].mxu0 %v4450_v41  ;;  %3924 = vmatpush3.bf16.msra.mxu1 %v4452_v42  ;;  %v657_v41 = vsub.s32 0, %v5325_v36  ;;  %v661_v42 = vsub.s32 1, %v5325_v36 }
 0x11f   : > { %2717 = vmatpush1.bf16.msra.mxu0 %v4447_v40  ;;  %3925 = vmatprep.subr.bf16.mxu1 %v4456_v45  ;;  %v5332_v40 = vcombine.low %v267_v29, %v267_v29  ;;  %v4528_v45 = vld [vmem:[%s4847_s9 + $0x818] ss:$12 sps:$4 sm:$0xff]   ;;  %v4574_v29 = vld [vmem:[%s4847_s9 + $0x85c] ss:$12 sps:$4 sm:$0xff]  }
 0x120   : > { %2718 = vmatprep.subr.bf16.mxu0 %v4455_v43  ;;  %3094 = vmatprep.mubr.bf16.mxu1 %v4458_v44  ;;  %v4523_v43 = vld [vmem:[%s4847_s9 + $0x750] ss:$12 sps:$4 sm:$0xff]  }
 0x121   : > { %2693 = vmatprep.mubr.bf16.mxu0 %v4458_v44  ;;  %v4531_v44 = vld [vmem:[%s4847_s9 + $0x76c] ss:$12 sps:$4 sm:$0xff]  }
 0x122   : > { %3926 = vmatpush3.bf16.msra.mxu1 %v4457_v47  ;;  %v5343_v47 = vld [vmem:[%s5589_s0 + $0x2c] ss:$48 sps:$4 sm:$0xff]  }
 0x123   : > { %2719 = vmatpush1.bf16.msra.mxu0 %v4453_v46  ;;  %3927 = vmatprep.subr.bf16.mxu1 %v4464_v48  ;;  %v4532_v46 = vld [vmem:[%s4847_s9 + $0x8f0] ss:$12 sps:$4 sm:$0xff]  }
 0x124   : > { %2720 = vmatprep.subr.bf16.mxu0 %v4462_v50  ;;  %v5346_v50 = vld [vmem:[%s4855_s10] sm:$0x7] }
 0x125   : > { %3095 = vmatmul.mubr.bf16.gmra.mrb[72].mxu1 %v4463_v52  ;;  %v5353_v48 = vrot.slane %v5346_v50, %v661_v42 }
 0x126   : > { %2694 = vmatmul.mubr.bf16.gmra.mrb[8].mxu0 %v4463_v52  ;;  %3928 = vmatpush3.bf16.msra.mxu1 %v4465_v54  ;;  %v5350_v52 = vrot.slane %v5346_v50, %v657_v41  ;;  %v4533_v54 = vld [vmem:[%s4847_s9 + $0x830] ss:$12 sps:$4 sm:$0xff]   ;;  %v4580_v41 = vld [vmem:[%s4847_s9 + $0x88c] ss:$12 sps:$4 sm:$0xff]  }
 0x127   : > { %2721 = vmatpush1.bf16.msra.mxu0 %v4460_v53  ;;  %3929 = vmatprep.subr.bf16.mxu1 %v4469_v56  ;;  %v4529_v53 = vld [vmem:[%s4847_s9 + $0x768] ss:$12 sps:$4 sm:$0xff]   ;;  %v4537_v56 = vld [vmem:[%s4847_s9 + $0x780] ss:$12 sps:$4 sm:$0xff]  }
 0x128   : > { %2722 = vmatprep.subr.bf16.mxu0 %v4468_v55  ;;  %3102 = vmatprep.mubr.bf16.mxu1 %v3460_v57  ;;  %v5362_v55 = vld [vmem:[%s5589_s0 + $0x28] ss:$48 sps:$4 sm:$0xff]  }
 0x129   : > { %2703 = vmatprep.mubr.bf16.mxu0 %v3460_v57  ;;  %v5368_v57 = vld [vmem:[%s5589_s0 + $0x8c] ss:$48 sps:$4 sm:$0xff]  }
 0x12a   : > { %3930 = vmatpush3.bf16.msra.mxu1 %v4470_v60  ;;  %v4540_v60 = vld [vmem:[%s4847_s9 + $0x798] ss:$12 sps:$4 sm:$0xff]  }
 0x12b   : > { %2723 = vmatpush1.bf16.msra.mxu0 %v4466_v59  ;;  %3931 = vmatprep.subr.bf16.mxu1 %v4476_v62  ;;  %v4542_v59 = vld [vmem:[%s4847_s9 + $0x79c] ss:$12 sps:$4 sm:$0xff]  }
 0x12c   : > { %2724 = vmatprep.subr.bf16.mxu0 %v4474_v61  ;;  %v4547_v61 = vld [vmem:[%s4847_s9 + $0x7b4] ss:$12 sps:$4 sm:$0xff]   ;;  %v5380_v62 = vld [vmem:[%s5589_s0 + $0x88] ss:$48 sps:$4 sm:$0xff]  }
 0x12d   : > { %3103 = vmatmul.mubr.bf16.gmra.mrb[76].mxu1 %v3459_v63 }
 0x12e   : > { %2704 = vmatmul.mubr.bf16.gmra.mrb[12].mxu0 %v3459_v63  ;;  %3932 = vmatpush3.bf16.msra.mxu1 %v4477_v0  ;;  %v5386_v63 = vld [vmem:[%s5589_s0 + $0xec] ss:$48 sps:$4 sm:$0xff]  }
 0x12f   : > { %2725 = vmatpush1.bf16.msra.mxu0 %v4472_v58  ;;  %3933 = vmatprep.subr.bf16.mxu1 %v4481_v1  ;;  %v4545_v58 = vld [vmem:[%s4847_s9 + $0x7b0] ss:$12 sps:$4 sm:$0xff]   ;;  %v4551_v0 = vld [vmem:[%s4847_s9 + $0x7cc] ss:$12 sps:$4 sm:$0xff]  }
 0x130   : > { %2726 = vmatprep.subr.bf16.mxu0 %v4480_v2  ;;  %3142 = vmatprep.mubr.bf16.mxu1 %v4485_v4  ;;  %v4549_v2 = vld [vmem:[%s4847_s9 + $0x7c8] ss:$12 sps:$4 sm:$0xff]   ;;  %v4556_v1 = vld [vmem:[%s4847_s9 + $0x7e4] ss:$12 sps:$4 sm:$0xff]  }
 0x131   : > { %2744 = vmatprep.mubr.bf16.mxu0 %v4485_v4  ;;  %v5401_v4 = vld [vmem:[%s5589_s0 + $0xe8] ss:$48 sps:$4 sm:$0xff]  }
 0x132   : > { %3934 = vmatpush3.bf16.msra.mxu1 %v4482_v6  ;;  %v4554_v6 = vld [vmem:[%s4847_s9 + $0x7e0] ss:$12 sps:$4 sm:$0xff]  }
 0x133   : > { %2727 = vmatpush1.bf16.msra.mxu0 %v4478_v3  ;;  %3959 = vmatprep.subr.bf16.mxu1 %v4489_v8  ;;  %v268_v3 = vld [vmem:[%s5589_s0 + $0x148] sm:$0xff] }
 0x134   : > { %2728 = vmatprep.subr.bf16.mxu0 %v4488_v7  ;;  %v5404_v7 = vcombine.high %v268_v3, %v268_v3  ;;  %v4560_v8 = vld [vmem:[%s4847_s9 + $0x7fc] ss:$12 sps:$4 sm:$0xff]  }
 0x135   : > { %3143 = vmatmul.mubr.bf16.vlgmr.msra.gmra.mrb[80].mxu1 %v5273_v9 }
 0x136   : > { %3960 = vmatpush3.bf16.msra.mxu1 %v4490_v11  ;;  %3150 = vmatprep.mubr.bf16.mxu1 %v5283_v15 }
 0x137   : > { %2729 = vmatpush1.bf16.msra.mxu0 %v4486_v10  ;;  %3961 = vmatprep.subr.bf16.mxu1 %v4494_v13  ;;  %v4564_v10 = vld [vmem:[%s4847_s9 + $0x814] ss:$12 sps:$4 sm:$0xff]  }
 0x138   : > { %2730 = vmatprep.subr.bf16.mxu0 %v4493_v12  ;;  %v5413_v12 = vcombine.low %v268_v3, %v268_v3 }
 0x13a   : > { %3962 = vmatpush3.bf16.msra.mxu1 %v4495_v16 }
 0x13b   : > { %2731 = vmatpush1.bf16.msra.mxu0 %v4491_v14  ;;  %3963 = vmatprep.subr.bf16.mxu1 %v4502_v18  ;;  %v4568_v18 = vld [vmem:[%s4847_s9 + $0x82c] ss:$12 sps:$4 sm:$0xff]  }
 0x13c   : > { %2732 = vmatprep.subr.bf16.mxu0 %v4500_v17 }
 0x13d   : > { %3151 = vmatmul.mubr.bf16.gmra.mrb[84].mxu1 %v5294_v20 }
 0x13e   : > { %3964 = vmatpush3.bf16.msra.mxu1 %v4503_v21  ;;  %3158 = vmatprep.mubr.bf16.mxu1 %v5302_v24 }
 0x13f   : > { %2733 = vmatpush1.bf16.msra.mxu0 %v4498_v19  ;;  %3965 = vmatprep.subr.bf16.mxu1 %v4507_v23  ;;  %v4571_v23 = vld [vmem:[%s4847_s9 + $0x844] ss:$12 sps:$4 sm:$0xff]  }
 0x140   : > { %2734 = vmatprep.subr.bf16.mxu0 %v4506_v22  ;;  %v4566_v22 = vld [vmem:[%s4847_s9 + $0x828] ss:$12 sps:$4 sm:$0xff]  }
 0x142   : > { %3966 = vmatpush3.bf16.msra.mxu1 %v4508_v26 }
 0x143   : > { %2735 = vmatpush1.bf16.msra.mxu0 %v4504_v25  ;;  %3967 = vmatprep.subr.bf16.mxu1 %v4515_v28 }
 0x144   : > { %2736 = vmatprep.subr.bf16.mxu0 %v4513_v27  ;;  %v4569_v27 = vld [vmem:[%s4847_s9 + $0x840] ss:$12 sps:$4 sm:$0xff]  }
 0x145   : > { %3159 = vmatmul.mubr.bf16.gmra.mrb[88].mxu1 %v5313_v51 }
 0x146   : > { %3968 = vmatpush3.bf16.msra.mxu1 %v4516_v32  ;;  %3166 = vmatprep.mubr.bf16.mxu1 %v5322_v35 }
 0x147   : > { %2737 = vmatpush1.bf16.msra.mxu0 %v4511_v31  ;;  %3969 = vmatprep.subr.bf16.mxu1 %v4520_v34  ;;  %v4577_v34 = vld [vmem:[%s4847_s9 + $0x874] ss:$12 sps:$4 sm:$0xff]  }
 0x148   : > { %2738 = vmatprep.subr.bf16.mxu0 %v4519_v5  ;;  %v4572_v5 = vld [vmem:[%s4847_s9 + $0x858] ss:$12 sps:$4 sm:$0xff]  }
 0x14a   : > { %3970 = vmatpush3.bf16.msra.mxu1 %v4521_v38 }
 0x14b   : > { %2739 = vmatpush1.bf16.msra.mxu0 %v4517_v33  ;;  %3971 = vmatprep.subr.bf16.mxu1 %v4527_v37 }
 0x14c   : > { %2740 = vmatprep.subr.bf16.mxu0 %v4525_v39  ;;  %v4575_v39 = vld [vmem:[%s4847_s9 + $0x870] ss:$12 sps:$4 sm:$0xff]  }
 0x14d   : > { %3167 = vmatmul.mubr.bf16.gmra.mrb[92].mxu1 %v5332_v40 }
 0x14e   : > { %3972 = vmatpush3.bf16.msra.mxu1 %v4528_v45  ;;  %3206 = vmatprep.mubr.bf16.mxu1 %v5343_v47 }
 0x14f   : > { %2741 = vmatpush1.bf16.msra.mxu0 %v4523_v43  ;;  %3973 = vmatprep.subr.bf16.mxu1 %v4532_v46  ;;  %v4583_v46 = vld [vmem:[%s4847_s9 + $0x8a4] ss:$12 sps:$4 sm:$0xff]  }
 0x150   : > { %2742 = vmatprep.subr.bf16.mxu0 %v4531_v44  ;;  %v4578_v44 = vld [vmem:[%s4847_s9 + $0x888] ss:$12 sps:$4 sm:$0xff]  }
 0x152   : > { %3974 = vmatpush3.bf16.msra.mxu1 %v4533_v54 }
 0x153   : > { %2743 = vmatpush1.bf16.msra.mxu0 %v4529_v53 }
 0x154   : > { %2783 = vmatprep.subr.bf16.mxu0 %v4539_v49  ;;  %v4581_v49 = vld [vmem:[%s4847_s9 + $0x8a0] ss:$12 sps:$4 sm:$0xff]  }
 0x155   : > { %3207 = vmatmul.mubr.bf16.vlgmr.msra.gmra.mrb[96].mxu1 %v5362_v55 }
 0x156   : > { %2745 = vmatmul.mubr.bf16.vlgmr.msra.gmra.mrb[0].mxu0 %v5273_v9  ;;  %3214 = vmatprep.mubr.bf16.mxu1 %v5368_v57  ;;  %v4558_v9 = vld [vmem:[%s4847_s9 + $0x7f8] ss:$12 sps:$4 sm:$0xff]  }
 0x157   : > { %2784 = vmatpush1.bf16.msra.mxu0 %v4537_v56  ;;  %2754 = vmatprep.mubr.bf16.mxu0 %v5283_v15  ;;  %v4562_v15 = vld [vmem:[%s4847_s9 + $0x810] ss:$12 sps:$4 sm:$0xff]  }
 0x158   : > { %2785 = vmatprep.subr.bf16.mxu0 %v4542_v59 }
 0x15b   : > { %2786 = vmatpush1.bf16.msra.mxu0 %v4540_v60  ;;  %v4586_v60 = vld [vmem:[%s4847_s9 + $0x8bc] ss:$12 sps:$4 sm:$0xff]  }
 0x15c   : > { %2787 = vmatprep.subr.bf16.mxu0 %v4547_v61 }
 0x15d   : > { %3215 = vmatmul.mubr.bf16.gmra.mrb[100].mxu1 %v5380_v62 }
 0x15e   : > { %2755 = vmatmul.mubr.bf16.gmra.mrb[4].mxu0 %v5294_v20  ;;  %3222 = vmatprep.mubr.bf16.mxu1 %v5386_v63 }
 0x15f   : > { %2788 = vmatpush1.bf16.msra.mxu0 %v4545_v58  ;;  %2764 = vmatprep.mubr.bf16.mxu0 %v5302_v24  ;;  %v4584_v58 = vld [vmem:[%s4847_s9 + $0x8b8] ss:$12 sps:$4 sm:$0xff]  }
 0x160   : > { %2789 = vmatprep.subr.bf16.mxu0 %v4551_v0  ;;  %v4589_v0 = vld [vmem:[%s4847_s9 + $0x8d4] ss:$12 sps:$4 sm:$0xff]  }
 0x163   : > { %2790 = vmatpush1.bf16.msra.mxu0 %v4549_v2 }
 0x164   : > { %2791 = vmatprep.subr.bf16.mxu0 %v4556_v1  ;;  %v4587_v1 = vld [vmem:[%s4847_s9 + $0x8d0] ss:$12 sps:$4 sm:$0xff]  }
 0x165   : > { %3223 = vmatmul.mubr.bf16.gmra.mrb[104].mxu1 %v5401_v4 }
 0x166   : > { %2765 = vmatmul.mubr.bf16.gmra.mrb[8].mxu0 %v5313_v51  ;;  %3230 = vmatprep.mubr.bf16.mxu1 %v5404_v7 }
 0x167   : > { %2792 = vmatpush1.bf16.msra.mxu0 %v4554_v6  ;;  %2774 = vmatprep.mubr.bf16.mxu0 %v5322_v35 }
 0x168   : > { %2793 = vmatprep.subr.bf16.mxu0 %v4560_v8  ;;  %v2462_v11 = vpop.f32.mrb[0].mxu1  ;;  %v4592_v8 = vld [vmem:[%s4847_s9 + $0x8ec] ss:$12 sps:$4 sm:$0xff]  }
 0x169   : > { %v5416_v13 = vadd.f32 %v2462_v11, %v5350_v52  ;;  %v2464_v14 = vpop.f32.mrb[1].mxu1 }
 0x16a   : > { %v5420_v16 = vadd.f32 %v2464_v14, %v5353_v48  ;;  %v2466_v17 = vpop.f32.mrb[2].mxu1 }
 0x16b   : > { %2794 = vmatpush1.bf16.msra.mxu0 %v4558_v9  ;;  %v5424_v19 = vadd.f32 %v2466_v17, %v5350_v52  ;;  %v2468_v20 = vpop.f32.mrb[3].mxu1 }
 0x16c   : > { %2795 = vmatprep.subr.bf16.mxu0 %v4564_v10  ;;  %v5427_v21 = vadd.f32 %v2468_v20, %v5353_v48  ;;  %v4590_v10 = vld [vmem:[%s4847_s9 + $0x8e8] ss:$12 sps:$4 sm:$0xff]   ;;  %s4095_s9 = smul.u32 168, %s4843_s30 }
 0x16d   : > { %3231 = vmatmul.mubr.bf16.gmra.mrb[108].mxu1 %v5413_v12  ;;  %s3758_s30 = smul.u32 (%p5600_p10), 24, %s4737_s16 }
 0x16e   : > { %2775 = vmatmul.mubr.bf16.gmra.mrb[12].mxu0 %v5332_v40  ;;  %s5489_s25 = scalar_lea.vmem [#allocation6], %s4095_s9 }
 0x16f   : > { %2796 = vmatpush1.bf16.msra.mxu0 %v4562_v15  ;;  %2815 = vmatprep.mubr.bf16.mxu0 %v5343_v47  ;;  %s5538_s28 = scalar_lea.vmem (%p5600_p10), %s5592_s3, %s3758_s30 }
 0x170   : > { %2797 = vmatprep.subr.bf16.mxu0 %v4568_v18  ;;  %v2472_v24 = vpop.f32.mrb[4].mxu1 }
 0x171   : > { %v5435_v25 = vadd.f32 %v2472_v24, %v5350_v52  ;;  %v2474_v26 = vpop.f32.mrb[5].mxu1 }
 0x172   : > { %v5439_v28 = vadd.f32 %v2474_v26, %v5353_v48  ;;  %v2476_v51 = vpop.f32.mrb[6].mxu1 }
 0x173   : > { %2798 = vmatpush1.bf16.msra.mxu0 %v4566_v22  ;;  %v5443_v30 = vadd.f32 %v2476_v51, %v5350_v52  ;;  %v2478_v31 = vpop.f32.mrb[7].mxu1 }
 0x174   : > { %2799 = vmatprep.subr.bf16.mxu0 %v4571_v23  ;;  %v5446_v32 = vadd.f32 %v2478_v31, %v5353_v48 }
 0x177   : > { %2800 = vmatpush1.bf16.msra.mxu0 %v4569_v27 }
 0x178   : > { %2801 = vmatprep.subr.bf16.mxu0 %v4574_v29  ;;  %v2482_v35 = vpop.f32.mrb[8].mxu1  ;;  %v665_v29 = vsub.s32 2, %v5325_v36 }
 0x179   : > { %v5451_v33 = vadd.f32 %v2482_v35, %v5350_v52  ;;  %v2484_v38 = vpop.f32.mrb[9].mxu1 }
 0x17a   : > { %v5455_v37 = vadd.f32 %v2484_v38, %v5353_v48  ;;  %v2486_v40 = vpop.f32.mrb[10].mxu1 }
 0x17b   : > { %2802 = vmatpush1.bf16.msra.mxu0 %v4572_v5  ;;  %v5459_v42 = vadd.f32 %v2486_v40, %v5350_v52  ;;  %v2488_v43 = vpop.f32.mrb[11].mxu1 }
 0x17c   : > { %2803 = vmatprep.subr.bf16.mxu0 %v4577_v34  ;;  %v5462_v45 = vadd.f32 %v2488_v43, %v5353_v48 }
 0x17f   : > { %2804 = vmatpush1.bf16.msra.mxu0 %v4575_v39 }
 0x180   : > { %2805 = vmatprep.subr.bf16.mxu0 %v4580_v41  ;;  %v2492_v47 = vpop.f32.mrb[12].mxu1 }
 0x181   : > { %v5467_v53 = vadd.f32 %v2492_v47, %v5350_v52  ;;  %v2494_v54 = vpop.f32.mrb[13].mxu1 }
 0x182   : > { %v5471_v56 = vadd.f32 %v2494_v54, %v5353_v48  ;;  %v2496_v59 = vpop.f32.mrb[14].mxu1 }
 0x183   : > { %2806 = vmatpush1.bf16.msra.mxu0 %v4578_v44  ;;  %v2497_v61 = vpop.f32.mrb[15].mxu1 }
 0x184   : > { %2807 = vmatprep.subr.bf16.mxu0 %v4583_v46 }
 0x187   : > { %2808 = vmatpush1.bf16.msra.mxu0 %v4581_v49 }
 0x188   : > { %2809 = vmatprep.subr.bf16.mxu0 %v4586_v60  ;;  %v3775_v2 = vpop.f32.mrb[16].mxu1 }
 0x189   : > { %v3776_v52 = vpop.f32.mrb[17].mxu1 }
 0x18a   : > { %v3777_v3 = vadd.f32 %v3776_v52, %v3775_v2  ;;  %v3778_v6 = vpop.f32.mrb[18].mxu1 }
 0x18b   : > { %2810 = vmatpush1.bf16.msra.mxu0 %v4584_v58  ;;  %v3779_v48 = vpop.f32.mrb[19].mxu1 }
 0x18c   : > { %2811 = vmatprep.subr.bf16.mxu0 %v4589_v0  ;;  %v3780_v9 = vadd.f32 %v3779_v48, %v3778_v6 }
 0x18f   : > { %2812 = vmatpush1.bf16.msra.mxu0 %v4587_v1 }
 0x190   : > { %2813 = vmatprep.subr.bf16.mxu0 %v4592_v8  ;;  %v3781_v11 = vpop.f32.mrb[20].mxu1 }
 0x191   : > { %v3782_v14 = vpop.f32.mrb[21].mxu1 }
 0x192   : > { %v3783_v15 = vadd.f32 %v3782_v14, %v3781_v11  ;;  %v3784_v17 = vpop.f32.mrb[22].mxu1 }
 0x193   : > { %2814 = vmatpush1.bf16.msra.mxu0 %v4590_v10  ;;  %v3785_v18 = vpop.f32.mrb[23].mxu1 }
 0x194   : > { %v3786_v20 = vadd.f32 %v3785_v18, %v3784_v17 }
 0x196   : > { %2816 = vmatmul.mubr.bf16.vlgmr.msra.gmra.mrb[0].mxu0 %v5362_v55  ;;  %v666_v55 = vrot.slane %v5346_v50, %v665_v29 }
 0x197   : > { %2825 = vmatprep.mubr.bf16.mxu0 %v5368_v57 }
 0x198   : > { %v3787_v22 = vpop.f32.mrb[24].mxu1  ;;  %v2889_v57 = vadd.f32 %v3777_v3, %v666_v55  ;;  %v2892_v41 = vadd.f32 %v3780_v9, %v666_v55  ;;  %v2897_v47 = vadd.f32 %v3783_v15, %v666_v55  ;;  %v2900_v50 = vadd.f32 %v3786_v20, %v666_v55 }
 0x199   : > { %v3788_v23 = vpop.f32.mrb[25].mxu1 }
 0x19a   : > { %v3789_v24 = vadd.f32 %v3788_v23, %v3787_v22  ;;  %v3790_v26 = vpop.f32.mrb[26].mxu1 }
 0x19b   : > { %v3791_v27 = vpop.f32.mrb[27].mxu1 }
 0x19c   : > { %v3792_v51 = vadd.f32 %v3791_v27, %v3790_v26  ;;  %v2905_v0 = vadd.f32 %v3789_v24, %v666_v55 }
 0x19e   : > { %2826 = vmatmul.mubr.bf16.gmra.mrb[4].mxu0 %v5380_v62  ;;  %v2908_v1 = vadd.f32 %v3792_v51, %v666_v55 }
 0x19f   : > { %2835 = vmatprep.mubr.bf16.mxu0 %v5386_v63 }
 0x1a0   : > { %v3793_v31 = vpop.f32.mrb[28].mxu1 }
 0x1a1   : > { %v3794_v5 = vpop.f32.mrb[29].mxu1 }
 0x1a2   : > { %v3795_v34 = vadd.f32 %v3794_v5, %v3793_v31  ;;  %v3796_v35 = vpop.f32.mrb[30].mxu1 }
 0x1a3   : > { %v3797_v38 = vpop.f32.mrb[31].mxu1 }
 0x1a4   : > { %v2913_v10 = vadd.f32 %v3795_v34, %v666_v55 }
 0x1a6   : > { %2836 = vmatmul.mubr.bf16.gmra.mrb[8].mxu0 %v5401_v4 }
 0x1a7   : > { %2845 = vmatprep.mubr.bf16.mxu0 %v5404_v7 }
 0x1a8   : > { %v3815_v39 = vpop.f32.mrb[32].mxu1 }
 0x1a9   : > { %v3816_v40 = vpop.f32.mrb[33].mxu1 }
 0x1aa   : > { %v3817_v62 = vadd.f32 %v3816_v40, %v3815_v39  ;;  %v3818_v43 = vpop.f32.mrb[34].mxu1 }
 0x1ab   : > { %v3819_v63 = vpop.f32.mrb[35].mxu1 }
 0x1ac   : > { %v2953_v44 = vadd.f32 %v3817_v62, %v2889_v57  ;;  %v3820_v36 = vadd.f32 %v3819_v63, %v3818_v43 }
 0x1ae   : > { %2846 = vmatmul.mubr.bf16.gmra.mrb[12].mxu0 %v5413_v12  ;;  %v2956_v46 = vadd.f32 %v3820_v36, %v2892_v41 }
 0x1b0   : > { %v3821_v54 = vpop.f32.mrb[36].mxu1 }
 0x1b1   : > { %v3822_v49 = vpop.f32.mrb[37].mxu1 }
 0x1b2   : > { %v3823_v59 = vadd.f32 %v3822_v49, %v3821_v54  ;;  %v3824_v4 = vpop.f32.mrb[38].mxu1 }
 0x1b3   : > { %v3825_v60 = vpop.f32.mrb[39].mxu1 }
 0x1b4   : > { %v2961_v7 = vadd.f32 %v3823_v59, %v2897_v47  ;;  %v3826_v61 = vadd.f32 %v3825_v60, %v3824_v4 }
 0x1b6   : > { %v2964_v58 = vadd.f32 %v3826_v61, %v2900_v50 }
 0x1b8   : > { %v3827_v2 = vpop.f32.mrb[40].mxu1 }
 0x1b9   : > { %v3828_v52 = vpop.f32.mrb[41].mxu1 }
 0x1ba   : > { %v3829_v3 = vadd.f32 %v3828_v52, %v3827_v2  ;;  %v3830_v6 = vpop.f32.mrb[42].mxu1 }
 0x1bb   : > { %v3831_v8 = vpop.f32.mrb[43].mxu1 }
 0x1bc   : > { %v2969_v48 = vadd.f32 %v3829_v3, %v2905_v0  ;;  %v3832_v12 = vadd.f32 %v3831_v8, %v3830_v6 }
 0x1be   : > { %v2972_v9 = vadd.f32 %v3832_v12, %v2908_v1 }
 0x1c0   : > { %v3833_v11 = vpop.f32.mrb[44].mxu1 }
 0x1c1   : > { %v3834_v14 = vpop.f32.mrb[45].mxu1 }
 0x1c2   : > { %v3835_v15 = vadd.f32 %v3834_v14, %v3833_v11  ;;  %v3836_v17 = vpop.f32.mrb[46].mxu1 }
 0x1c3   : > { %v3837_v18 = vpop.f32.mrb[47].mxu1 }
 0x1c4   : > { %v2977_v20 = vadd.f32 %v3835_v15, %v2913_v10 }
 0x1c8   : > { %v3855_v22 = vpop.f32.mrb[48].mxu1 }
 0x1c9   : > { %v3856_v23 = vpop.f32.mrb[49].mxu1 }
 0x1ca   : > { %v3857_v26 = vadd.f32 %v3856_v23, %v3855_v22  ;;  %v3858_v24 = vpop.f32.mrb[50].mxu1 }
 0x1cb   : > { %v3859_v27 = vpop.f32.mrb[51].mxu1 }
 0x1cc   : > { %v3017_v29 = vadd.f32 %v3857_v26, %v2953_v44  ;;  %v3860_v51 = vadd.f32 %v3859_v27, %v3858_v24 }
 0x1ce   : > { %v3020_v31 = vadd.f32 %v3860_v51, %v2956_v46 }
 0x1d0   : > { %v3861_v5 = vpop.f32.mrb[52].mxu1 }
 0x1d1   : > { %v3862_v35 = vpop.f32.mrb[53].mxu1 }
 0x1d2   : > { %v3863_v38 = vadd.f32 %v3862_v35, %v3861_v5  ;;  %v3864_v57 = vpop.f32.mrb[54].mxu1 }
 0x1d3   : > { %v3865_v39 = vpop.f32.mrb[55].mxu1 }
 0x1d4   : > { %v3025_v34 = vadd.f32 %v3863_v38, %v2961_v7  ;;  %v3866_v55 = vadd.f32 %v3865_v39, %v3864_v57 }
 0x1d6   : > { %v3028_v40 = vadd.f32 %v3866_v55, %v2964_v58 }
 0x1d8   : > { %v3867_v41 = vpop.f32.mrb[56].mxu1 }
 0x1d9   : > { %v3868_v62 = vpop.f32.mrb[57].mxu1 }
 0x1da   : > { %v3869_v43 = vadd.f32 %v3868_v62, %v3867_v41  ;;  %v3870_v63 = vpop.f32.mrb[58].mxu1 }
 0x1db   : > { %v3871_v36 = vpop.f32.mrb[59].mxu1 }
 0x1dc   : > { %v3033_v47 = vadd.f32 %v3869_v43, %v2969_v48  ;;  %v3872_v54 = vadd.f32 %v3871_v36, %v3870_v63 }
 0x1de   : > { %v3036_v49 = vadd.f32 %v3872_v54, %v2972_v9 }
 0x1e0   : > { %v3873_v50 = vpop.f32.mrb[60].mxu1 }
 0x1e1   : > { %v3874_v44 = vpop.f32.mrb[61].mxu1 }
 0x1e2   : > { %v3875_v59 = vadd.f32 %v3874_v44, %v3873_v50  ;;  %v3876_v46 = vpop.f32.mrb[62].mxu1 }
 0x1e3   : > { %v3877_v4 = vpop.f32.mrb[63].mxu1 }
 0x1e4   : > { %v3041_v60 = vadd.f32 %v3875_v59, %v2977_v20 }
 0x1e8   : > { %v3895_v61 = vpop.f32.mrb[64].mxu1 }
 0x1e9   : > { %v3896_v0 = vpop.f32.mrb[65].mxu1 }
 0x1ea   : > { %v3897_v2 = vadd.f32 %v3896_v0, %v3895_v61  ;;  %v3898_v7 = vpop.f32.mrb[66].mxu1 }
 0x1eb   : > { %v3899_v52 = vpop.f32.mrb[67].mxu1 }
 0x1ec   : > { %v3081_v58 = vadd.f32 %v3897_v2, %v3017_v29  ;;  %v3900_v1 = vadd.f32 %v3899_v52, %v3898_v7 }
 0x1ee   : > { %v3084_v3 = vadd.f32 %v3900_v1, %v3020_v31 }
 0x1f0   : > { %v3901_v6 = vpop.f32.mrb[68].mxu1 }
 0x1f1   : > { %v3902_v8 = vpop.f32.mrb[69].mxu1 }
 0x1f2   : > { %v3903_v12 = vadd.f32 %v3902_v8, %v3901_v6  ;;  %v3904_v48 = vpop.f32.mrb[70].mxu1 }
 0x1f3   : > { %v3905_v10 = vpop.f32.mrb[71].mxu1 }
 0x1f4   : > { %v3089_v9 = vadd.f32 %v3903_v12, %v3025_v34  ;;  %v3906_v11 = vadd.f32 %v3905_v10, %v3904_v48 }
 0x1f6   : > { %v3092_v14 = vadd.f32 %v3906_v11, %v3028_v40 }
 0x1f8   : > { %v3907_v15 = vpop.f32.mrb[72].mxu1 }
 0x1f9   : > { %v3908_v17 = vpop.f32.mrb[73].mxu1 }
 0x1fa   : > { %v3909_v18 = vadd.f32 %v3908_v17, %v3907_v15  ;;  %v3910_v20 = vpop.f32.mrb[74].mxu1 }
 0x1fb   : > { %v3911_v22 = vpop.f32.mrb[75].mxu1 }
 0x1fc   : > { %v3097_v23 = vadd.f32 %v3909_v18, %v3033_v47  ;;  %v3912_v26 = vadd.f32 %v3911_v22, %v3910_v20 }
 0x1fe   : > { %v3100_v24 = vadd.f32 %v3912_v26, %v3036_v49 }
 0x200   : > { %v3913_v27 = vpop.f32.mrb[76].mxu1 }
 0x201   : > { %v3914_v29 = vpop.f32.mrb[77].mxu1 }
 0x202   : > { %v3915_v51 = vadd.f32 %v3914_v29, %v3913_v27  ;;  %v3916_v31 = vpop.f32.mrb[78].mxu1 }
 0x203   : > { %v3917_v5 = vpop.f32.mrb[79].mxu1 }
 0x204   : > { %v3105_v35 = vadd.f32 %v3915_v51, %v3041_v60 }
 0x208   : > { %v3935_v38 = vpop.f32.mrb[80].mxu1 }
 0x209   : > { %v3936_v57 = vpop.f32.mrb[81].mxu1 }
 0x20a   : > { %v3937_v39 = vadd.f32 %v3936_v57, %v3935_v38  ;;  %v3938_v34 = vpop.f32.mrb[82].mxu1 }
 0x20b   : > { %v3939_v55 = vpop.f32.mrb[83].mxu1 }
 0x20c   : > { %v3145_v40 = vadd.f32 %v3937_v39, %v3081_v58  ;;  %v3940_v41 = vadd.f32 %v3939_v55, %v3938_v34 }
 0x20e   : > { %v3148_v62 = vadd.f32 %v3940_v41, %v3084_v3 }
 0x210   : > { %v3941_v43 = vpop.f32.mrb[84].mxu1 }
 0x211   : > { %v3942_v63 = vpop.f32.mrb[85].mxu1 }
 0x212   : > { %v3943_v36 = vadd.f32 %v3942_v63, %v3941_v43  ;;  %v3944_v47 = vpop.f32.mrb[86].mxu1 }
 0x213   : > { %v3945_v54 = vpop.f32.mrb[87].mxu1 }
 0x214   : > { %v3153_v49 = vadd.f32 %v3943_v36, %v3089_v9  ;;  %v3946_v50 = vadd.f32 %v3945_v54, %v3944_v47 }
 0x216   : > { %v3156_v44 = vadd.f32 %v3946_v50, %v3092_v14 }
 0x218   : > { %v3947_v59 = vpop.f32.mrb[88].mxu1 }
 0x219   : > { %v3948_v46 = vpop.f32.mrb[89].mxu1 }
 0x21a   : > { %v3949_v4 = vadd.f32 %v3948_v46, %v3947_v59  ;;  %v3950_v60 = vpop.f32.mrb[90].mxu1 }
 0x21b   : > { %v3951_v61 = vpop.f32.mrb[91].mxu1 }
 0x21c   : > { %v3161_v0 = vadd.f32 %v3949_v4, %v3097_v23  ;;  %v3952_v2 = vadd.f32 %v3951_v61, %v3950_v60 }
 0x21e   : > { %v3164_v7 = vadd.f32 %v3952_v2, %v3100_v24 }
 0x220   : > { %v3953_v52 = vpop.f32.mrb[92].mxu1 }
 0x221   : > { %v3954_v58 = vpop.f32.mrb[93].mxu1 }
 0x222   : > { %v3955_v1 = vadd.f32 %v3954_v58, %v3953_v52  ;;  %v3956_v3 = vpop.f32.mrb[94].mxu1 }
 0x223   : > { %v3957_v6 = vpop.f32.mrb[95].mxu1 }
 0x224   : > { %v3169_v8 = vadd.f32 %v3955_v1, %v3105_v35 }
 0x228   : > { %v3975_v12 = vpop.f32.mrb[96].mxu1 }
 0x229   : > { %v3976_v48 = vpop.f32.mrb[97].mxu1 }
 0x22a   : > { %v3977_v10 = vadd.f32 %v3976_v48, %v3975_v12  ;;  %v3978_v9 = vpop.f32.mrb[98].mxu1 }
 0x22b   : > { %v3979_v11 = vpop.f32.mrb[99].mxu1 }
 0x22c   : > { %v3209_v14 = vadd.f32 %v3977_v10, %v3145_v40  ;;  %v3980_v15 = vadd.f32 %v3979_v11, %v3978_v9 }
 0x22e   : > { %3240 = vst [vmem:[%s5489_s25 + $0x10] sm:$0xff] %v3209_v14  ;;  %v3212_v17 = vadd.f32 %v3980_v15, %v3148_v62 }
 0x230   : > { %3243 = vst [vmem:[%s5489_s25 + $0x28] sm:$0xff] %v3212_v17  ;;  %v3981_v18 = vpop.f32.mrb[100].mxu1 }
 0x231   : > { %v3982_v20 = vpop.f32.mrb[101].mxu1 }
 0x232   : > { %v3983_v22 = vadd.f32 %v3982_v20, %v3981_v18  ;;  %v3984_v23 = vpop.f32.mrb[102].mxu1 }
 0x233   : > { %v3985_v26 = vpop.f32.mrb[103].mxu1 }
 0x234   : > { %v3217_v24 = vadd.f32 %v3983_v22, %v3153_v49  ;;  %v3986_v27 = vadd.f32 %v3985_v26, %v3984_v23 }
 0x236   : > { %3246 = vst [vmem:[%s5489_s25 + $0x40] sm:$0xff] %v3217_v24  ;;  %v3220_v29 = vadd.f32 %v3986_v27, %v3156_v44 }
 0x237   : > { %v3291_v48 = vld [vmem:[%s5489_s25 + $0x28] sm:$0xff] (%p5600_p10) }
 0x238   : > { %3249 = vst [vmem:[%s5489_s25 + $0x58] sm:$0xff] %v3220_v29  ;;  %v3987_v51 = vpop.f32.mrb[104].mxu1  ;;  %3292 = vst [vmem:[%s5538_s28 + $0x40] sm:$0xff] (%p5600_p10), %v3291_v48 }
 0x239   : > { %v3988_v31 = vpop.f32.mrb[105].mxu1 }
 0x23a   : > { %v3989_v5 = vadd.f32 %v3988_v31, %v3987_v51  ;;  %v3990_v35 = vpop.f32.mrb[106].mxu1 }
 0x23b   : > { %v3991_v38 = vpop.f32.mrb[107].mxu1 }
 0x23c   : > { %v3225_v57 = vadd.f32 %v3989_v5, %v3161_v0  ;;  %v3992_v39 = vadd.f32 %v3991_v38, %v3990_v35 }
 0x23d   : > { %v3297_v11 = vld [vmem:[%s5489_s25 + $0x40] sm:$0xff] (%p5600_p10) }
 0x23e   : > { %3252 = vst [vmem:[%s5489_s25 + $0x70] sm:$0xff] %v3225_v57  ;;  %v3228_v34 = vadd.f32 %v3992_v39, %v3164_v7  ;;  %3298 = vst [vmem:[%s5538_s28 + $0x70] sm:$0xff] (%p5600_p10), %v3297_v11 }
 0x23f   : > { %v3303_v17 = vld [vmem:[%s5489_s25 + $0x58] sm:$0xff] (%p5600_p10) }
 0x240   : > { %3255 = vst [vmem:[%s5489_s25 + $0x88] sm:$0xff] %v3228_v34  ;;  %v3993_v55 = vpop.f32.mrb[108].mxu1  ;;  %3304 = vst [vmem:[%s5538_s28 + $0xa0] sm:$0xff] (%p5600_p10), %v3303_v17 }
 0x241   : > { %v3994_v40 = vpop.f32.mrb[109].mxu1 }
 0x242   : > { %v3995_v41 = vadd.f32 %v3994_v40, %v3993_v55  ;;  %v3996_v62 = vpop.f32.mrb[110].mxu1 }
 0x243   : > { %v3997_v43 = vpop.f32.mrb[111].mxu1 }
 0x244   : > { %v3233_v63 = vadd.f32 %v3995_v41, %v3169_v8 }
 0x245   : > { %v3309_v22 = vld [vmem:[%s5489_s25 + $0x70] sm:$0xff] (%p5600_p10) }
 0x246   : > { %3258 = vst [vmem:[%s5489_s25 + $0xa0] sm:$0xff] %v3233_v63  ;;  %3310 = vst [vmem:[%s5538_s28 + $0xd0] sm:$0xff] (%p5600_p10), %v3309_v22 }
 0x247   : > { %v3315_v24 = vld [vmem:[%s5489_s25 + $0x88] sm:$0xff] (%p5600_p10) }
 0x248   : > { %3316 = vst [vmem:[%s5538_s28 + $0x100] sm:$0xff] (%p5600_p10), %v3315_v24 }
 0x24d   : > { %v3321_v51 = vld [vmem:[%s5489_s25 + $0xa0] sm:$0xff] (%p5600_p10) }
 0x24e   : > { %3322 = vst [vmem:[%s5538_s28 + $0x130] sm:$0xff] (%p5600_p10), %v3321_v51 }
 0x269   : > { %v2817_v36 = vpop.f32.mrb[0].mxu0 }
 0x26a   : > { %v4000_v47 = vadd.f32 %v2817_v36, %v5416_v13  ;;  %v2819_v54 = vpop.f32.mrb[1].mxu0 }
 0x26b   : > { %v4002_v49 = vadd.f32 %v2819_v54, %v5420_v16  ;;  %v2821_v50 = vpop.f32.mrb[2].mxu0 }
 0x26c   : > { %3238 = vst [vmem:[%s5489_s25] sm:$0xff] %v4000_v47  ;;  %v4004_v44 = vadd.f32 %v2821_v50, %v5424_v19  ;;  %v2823_v59 = vpop.f32.mrb[3].mxu0 }
 0x26d   : > { %3239 = vst [vmem:[%s5489_s25 + $0x8] sm:$0xff] %v4002_v49  ;;  %v4006_v46 = vadd.f32 %v2823_v59, %v5427_v21 }
 0x26e   : > { %3241 = vst [vmem:[%s5489_s25 + $0x18] sm:$0xff] %v4004_v44 }
 0x26f   : > { %3242 = vst [vmem:[%s5489_s25 + $0x20] sm:$0xff] %v4006_v46 }
 0x271   : > { %v2827_v4 = vpop.f32.mrb[4].mxu0 }
 0x272   : > { %v4008_v13 = vadd.f32 %v2827_v4, %v5435_v25  ;;  %v2829_v60 = vpop.f32.mrb[5].mxu0 }
 0x273   : > { %v4010_v16 = vadd.f32 %v2829_v60, %v5439_v28  ;;  %v2831_v61 = vpop.f32.mrb[6].mxu0 }
 0x274   : > { %3244 = vst [vmem:[%s5489_s25 + $0x30] sm:$0xff] %v4008_v13  ;;  %v4012_v19 = vadd.f32 %v2831_v61, %v5443_v30  ;;  %v2833_v0 = vpop.f32.mrb[7].mxu0 }
 0x275   : > { %3245 = vst [vmem:[%s5489_s25 + $0x38] sm:$0xff] %v4010_v16  ;;  %v4014_v21 = vadd.f32 %v2833_v0, %v5446_v32 }
 0x276   : > { %3247 = vst [vmem:[%s5489_s25 + $0x48] sm:$0xff] %v4012_v19  ;;  %v3289_v12 = vld [vmem:[%s5489_s25 + $0x20] sm:$0xff] (%p5600_p10) }
 0x277   : > { %3248 = vst [vmem:[%s5489_s25 + $0x50] sm:$0xff] %v4014_v21  ;;  %3290 = vst [vmem:[%s5538_s28 + $0x38] sm:$0xff] (%p5600_p10), %v3289_v12 }
 0x279   : > { %v2837_v2 = vpop.f32.mrb[8].mxu0 }
 0x27a   : > { %v4016_v25 = vadd.f32 %v2837_v2, %v5451_v33  ;;  %v2839_v7 = vpop.f32.mrb[9].mxu0 }
 0x27b   : > { %v4018_v28 = vadd.f32 %v2839_v7, %v5455_v37  ;;  %v2841_v52 = vpop.f32.mrb[10].mxu0  ;;  %v3293_v10 = vld [vmem:[%s5489_s25 + $0x30] sm:$0xff] (%p5600_p10) }
 0x27c   : > { %3250 = vst [vmem:[%s5489_s25 + $0x60] sm:$0xff] %v4016_v25  ;;  %v4020_v30 = vadd.f32 %v2841_v52, %v5459_v42  ;;  %v2843_v58 = vpop.f32.mrb[11].mxu0  ;;  %v3281_v42 = vld [vmem:[%s5489_s25] sm:$0xff] (%p5600_p10)  ;;  %v3295_v9 = vld [vmem:[%s5489_s25 + $0x38] sm:$0xff] (%p5600_p10)  ;;  %3294 = vst [vmem:[%s5538_s28 + $0x60] sm:$0xff] (%p5600_p10), %v3293_v10 }
 0x27d   : > { %3251 = vst [vmem:[%s5489_s25 + $0x68] sm:$0xff] %v4018_v28  ;;  %v4022_v1 = vadd.f32 %v2843_v58, %v5462_v45  ;;  %v3283_v45 = vld [vmem:[%s5489_s25 + $0x8] sm:$0xff] (%p5600_p10)  ;;  %3282 = vst [vmem:[%s5538_s28] sm:$0xff] (%p5600_p10), %v3281_v42 }
 0x27e   : > { %3253 = vst [vmem:[%s5489_s25 + $0x78] sm:$0xff] %v4020_v30  ;;  %3284 = vst [vmem:[%s5538_s28 + $0x8] sm:$0xff] (%p5600_p10), %v3283_v45  ;;  %v3299_v14 = vld [vmem:[%s5489_s25 + $0x48] sm:$0xff] (%p5600_p10)  ;;  %v3301_v15 = vld [vmem:[%s5489_s25 + $0x50] sm:$0xff] (%p5600_p10) }
 0x27f   : > { %3254 = vst [vmem:[%s5489_s25 + $0x80] sm:$0xff] %v4022_v1  ;;  %3265 = sbr.rel (!%p5600_p10) target bundleno = 654 (0x28e), region = 44  ;;  %3296 = vst [vmem:[%s5538_s28 + $0x68] sm:$0xff] (%p5600_p10), %v3295_v9 }
 0x280   : > { %3300 = vst [vmem:[%s5538_s28 + $0x90] sm:$0xff] (%p5600_p10), %v3299_v14  ;;  %3302 = vst [vmem:[%s5538_s28 + $0x98] sm:$0xff] (%p5600_p10), %v3301_v15 }
 0x281   : > { %v2847_v32 = vpop.f32.mrb[12].mxu0 }
 0x282   : > { %v4024_v3 = vadd.f32 %v2847_v32, %v5467_v53  ;;  %v2849_v6 = vpop.f32.mrb[13].mxu0  ;;  %v3285_v53 = vld [vmem:[%s5489_s25 + $0x10] sm:$0xff] (%p5600_p10) }
 0x283   : > { %v4026_v33 = vadd.f32 %v2849_v6, %v5471_v56  ;;  %v2851_v8 = vpop.f32.mrb[14].mxu0  ;;  %v3287_v56 = vld [vmem:[%s5489_s25 + $0x18] sm:$0xff] (%p5600_p10)  ;;  %3286 = vst [vmem:[%s5538_s28 + $0x10] sm:$0xff] (%p5600_p10), %v3285_v53  ;;  %v3305_v18 = vld [vmem:[%s5489_s25 + $0x60] sm:$0xff] (%p5600_p10) }
 0x284   : > { %3256 = vst [vmem:[%s5489_s25 + $0x90] sm:$0xff] %v4024_v3  ;;  %v2852_v37 = vpop.f32.mrb[15].mxu0  ;;  %3288 = vst [vmem:[%s5538_s28 + $0x30] sm:$0xff] (%p5600_p10), %v3287_v56  ;;  %v3307_v20 = vld [vmem:[%s5489_s25 + $0x68] sm:$0xff] (%p5600_p10) }
 0x285   : > { %3257 = vst [vmem:[%s5489_s25 + $0x98] sm:$0xff] %v4026_v33  ;;  %3306 = vst [vmem:[%s5538_s28 + $0xc0] sm:$0xff] (%p5600_p10), %v3305_v18  ;;  %v3311_v23 = vld [vmem:[%s5489_s25 + $0x78] sm:$0xff] (%p5600_p10) }
 0x286   : > { %3308 = vst [vmem:[%s5538_s28 + $0xc8] sm:$0xff] %v3307_v20  ;;  %v3313_v26 = vld [vmem:[%s5489_s25 + $0x80] sm:$0xff]  ;;  %3312 = vst [vmem:[%s5538_s28 + $0xf0] sm:$0xff] %v3311_v23 }
 0x287   : > { %3314 = vst [vmem:[%s5538_s28 + $0xf8] sm:$0xff] %v3313_v26 }
 0x28b   : > { %v3317_v27 = vld [vmem:[%s5489_s25 + $0x90] sm:$0xff] }
 0x28c   : > { %v3319_v29 = vld [vmem:[%s5489_s25 + $0x98] sm:$0xff]  ;;  %3318 = vst [vmem:[%s5538_s28 + $0x120] sm:$0xff] %v3317_v27 }
 0x28d   : > { %3320 = vst [vmem:[%s5538_s28 + $0x128] sm:$0xff] %v3319_v29 }
 0x28e PF: > { %p16_p12 = scmp.ge.s32.totalorder %s4740_s17, 4   ;;  %s5601_s12 = smov %s4683_s13 }
 0x28f   : > { %s5602_s13 = smov %s4687_s14  ;;  %s5603_s14 = smov %s4750_s20 }
 0x290   : > { %s5604_s15 = smov %s4740_s17  ;;  %18 = sbr.rel (!%p16_p12) target bundleno = 5 (0x5), region = 108 }
 0x297   :  { %3338 = vsyncpa [#allocation3], 1 }
 0x298   :  { %3340 = vsyncpa [#allocation3 + $0x1], 1 }
 0x299   :  { %3341 = vsyncpa [#allocation5], 1 }
 0x29a   :  { %3343 = vsyncpa [#allocation5 + $0x1], 1 }

</bundles_post_ra>
